<compile_context>
chip_gen: v6e
topology: v6e:2x2x1
jax: 0.10.0
libtpu: 0.0.40
codegen_flags: <defaults>
</compile_context>

<pallas_src>
import functools

import jax
import jax.numpy as jnp
from jax.experimental import pallas as pl
from jax.experimental.pallas import tpu as pltpu

_VMEM = pl.BlockSpec(memory_space=pltpu.MemorySpace.VMEM)
_EPS = 1e-5
_LANE = 128


def _round_up(x, mult):
    return ((x + mult - 1) // mult) * mult


# ----------------------------- Pallas kernels ------------------------------

def _conv_bn_relu_kernel(x_ref, w_ref, g_ref, b_ref, o_ref, *, eps, inv_m):
    """1x1 conv (MXU, bf16 operands / f32 acc) + training-mode BN + ReLU."""
    y = jnp.dot(w_ref[...].astype(jnp.bfloat16),
                x_ref[...].astype(jnp.bfloat16),
                preferred_element_type=jnp.float32)
    # single-pass batch stats over the lane axis (= N*H*W). Zero-padded
    # columns contribute nothing to either sum; inv_m uses the true count.
    s1 = jnp.sum(y, axis=1, keepdims=True)
    s2 = jnp.sum(y * y, axis=1, keepdims=True)
    mean = s1 * inv_m
    var = s2 * inv_m - mean * mean
    scale = jax.lax.rsqrt(var + eps) * g_ref[...]
    o_ref[...] = jnp.maximum((y - mean) * scale + b_ref[...], 0.0)


def _fu_conv_bn_relu_kernel(re_ref, im_ref, wr_ref, wi_ref, g_ref, b_ref,
                            o_ref, *, eps, inv_m):
    """FourierUnit conv over cat([real, imag]) done as two dots (no concat),
    fused with training-mode BN + ReLU."""
    y = (jnp.dot(wr_ref[...].astype(jnp.bfloat16),
                 re_ref[...].astype(jnp.bfloat16),
                 preferred_element_type=jnp.float32)
         + jnp.dot(wi_ref[...].astype(jnp.bfloat16),
                   im_ref[...].astype(jnp.bfloat16),
                   preferred_element_type=jnp.float32))
    s1 = jnp.sum(y, axis=1, keepdims=True)
    s2 = jnp.sum(y * y, axis=1, keepdims=True)
    mean = s1 * inv_m
    var = s2 * inv_m - mean * mean
    scale = jax.lax.rsqrt(var + eps) * g_ref[...]
    o_ref[...] = jnp.maximum((y - mean) * scale + b_ref[...], 0.0)


def _ffc_out_kernel(xl_ref, xg_ref, x1_ref, fu_ref, lfu_ref,
                    wl2l_ref, wg2l_ref, wl2g_ref, wc2_ref,
                    ol_ref, og_ref):
    """Both FFC output branches in one kernel (MXU drains once):
         out_xl = w_l2l@xl + w_g2l@xg
         out_xg = w_l2g@xl + w_conv2@(x1 + fu + lfu)
    """
    bf = jnp.bfloat16
    xl = xl_ref[...].astype(bf)
    xg = xg_ref[...].astype(bf)
    s = (x1_ref[...] + fu_ref[...] + lfu_ref[...]).astype(bf)
    ol_ref[...] = (
        jnp.dot(wl2l_ref[...].astype(bf), xl, preferred_element_type=jnp.float32)
        + jnp.dot(wg2l_ref[...].astype(bf), xg, preferred_element_type=jnp.float32))
    og_ref[...] = (
        jnp.dot(wl2g_ref[...].astype(bf), xl, preferred_element_type=jnp.float32)
        + jnp.dot(wc2_ref[...].astype(bf), s, preferred_element_type=jnp.float32))


# ----------------------------- kernel wrappers ------------------------------

def conv_bn_relu_cm(x_cm, w, gamma, beta, m_valid):
    cout, m = w.shape[0], x_cm.shape[1]
    kern = functools.partial(_conv_bn_relu_kernel, eps=_EPS, inv_m=1.0 / m_valid)
    return pl.pallas_call(
        kern,
        out_shape=jax.ShapeDtypeStruct((cout, m), jnp.float32),
        in_specs=[_VMEM] * 4,
        out_specs=_VMEM,
    )(x_cm, w, gamma.reshape(cout, 1), beta.reshape(cout, 1))


def fu_conv_bn_relu_cm(re_cm, im_cm, w_re, w_im, gamma, beta, m_valid):
    cout, m = w_re.shape[0], re_cm.shape[1]
    kern = functools.partial(_fu_conv_bn_relu_kernel, eps=_EPS, inv_m=1.0 / m_valid)
    return pl.pallas_call(
        kern,
        out_shape=jax.ShapeDtypeStruct((cout, m), jnp.float32),
        in_specs=[_VMEM] * 6,
        out_specs=_VMEM,
    )(re_cm, im_cm, w_re, w_im, gamma.reshape(cout, 1), beta.reshape(cout, 1))


def ffc_out_fused(xl_cm, xg_cm, x1_cm, fu_cm, lfu_cm,
                  w_l2l, w_g2l, w_l2g, w_c2, *, tile_m=512):
    m = xl_cm.shape[1]
    tile_m = min(tile_m, m)
    assert m % tile_m == 0 and tile_m % _LANE == 0
    out_cl, out_cg = w_l2l.shape[0], w_l2g.shape[0]

    def act_spec(c):
        return pl.BlockSpec((c, tile_m), lambda i: (0, i))

    def w_spec(w):
        return pl.BlockSpec(w.shape, lambda i: (0, 0))

    return pl.pallas_call(
        _ffc_out_kernel,
        out_shape=(jax.ShapeDtypeStruct((out_cl, m), jnp.float32),
                   jax.ShapeDtypeStruct((out_cg, m), jnp.float32)),
        grid=(m // tile_m,),
        in_specs=[act_spec(xl_cm.shape[0]), act_spec(xg_cm.shape[0]),
                  act_spec(x1_cm.shape[0]), act_spec(fu_cm.shape[0]),
                  act_spec(lfu_cm.shape[0]),
                  w_spec(w_l2l), w_spec(w_g2l), w_spec(w_l2g), w_spec(w_c2)],
        out_specs=(act_spec(out_cl), act_spec(out_cg)),
        compiler_params=pltpu.CompilerParams(
            dimension_semantics=("parallel",)),
    )(xl_cm, xg_cm, x1_cm, fu_cm, lfu_cm, w_l2l, w_g2l, w_l2g, w_c2)


# ----------------------------- module forward -------------------------------

def fourier_unit(x, w_conv, gamma, beta):
    """FourierUnit.forward (high-torch path), channels-leading (C,N,H,W) in/out."""
    c, n, h, wd = x.shape
    f = jnp.fft.rfft2(x, s=(h, wd), axes=(2, 3), norm="ortho")
    wf = f.shape[3]
    m = n * h * wf
    m_pad = _round_up(m, _LANE)
    re = f.real.reshape(c, m)
    im = f.imag.reshape(c, m)
    if m_pad != m:  # lane-dense pad; BN stats still use the true count m
        re = jnp.pad(re, ((0, 0), (0, m_pad - m)))
        im = jnp.pad(im, ((0, 0), (0, m_pad - m)))
    # conv over cat([real, imag], channels) == W[:, :c]@real + W[:, c:]@imag
    y = fu_conv_bn_relu_cm(re, im, w_conv[:, :c], w_conv[:, c:], gamma, beta, m)
    y = y[:, :m].reshape(2 * c, n, h, wf)
    return jnp.fft.irfft2(y[:c] + 1j * y[c:], s=(h, wd), axes=(2, 3), norm="ortho")


def spectral_transform_branches(xg_cm, n, h, w, p):
    """SpectralTransform.forward up to (not including) conv2, stride=1.

    Returns (x1, fu(x1), tiled lfu) as (C, M) slabs; conv2 itself is fused
    into the final FFC output kernel.
    """
    m = n * h * w
    # downsample == Identity (stride == 1)
    x1_cm = conv_bn_relu_cm(xg_cm, p["w_conv1"], p["bn1_g"], p["bn1_b"], m)
    c_half = p["w_conv1"].shape[0]
    x1 = x1_cm.reshape(c_half, n, h, w)            # pure reshape

    fu_cm = fourier_unit(x1, p["fu_w"], p["fu_bn_g"], p["fu_bn_b"]).reshape(c_half, m)

    # LFU branch
    split_no = 2
    xs = jnp.concatenate(jnp.split(x1[:c_half // 4], split_no, axis=2), axis=0)
    xs = jnp.concatenate(jnp.split(xs, split_no, axis=3), axis=0)
    xs = fourier_unit(xs, p["lfu_w"], p["lfu_bn_g"], p["lfu_bn_b"])
    # TODO(synk): fold this tiny 2x2 spatial repeat into _ffc_out_kernel.
    lfu_cm = jnp.tile(xs, (1, 1, split_no, split_no)).reshape(c_half, m)

    return x1_cm, fu_cm, lfu_cm


def ffc_forward(x_l, x_g, params):
    """FFC.forward for tuple input (x_l, x_g), ratio_gin=ratio_gout=0.5.

    NCHW in / NCHW out; internally channels-leading, reshape-only plumbing.
    """
    n, _, h, w = x_l.shape
    m = n * h * w
    xl_cm = jnp.transpose(x_l, (1, 0, 2, 3)).reshape(-1, m)
    xg_cm = jnp.transpose(x_g, (1, 0, 2, 3)).reshape(-1, m)

    x1_cm, fu_cm, lfu_cm = spectral_transform_branches(xg_cm, n, h, w, params["st"])

    out_xl_cm, out_xg_cm = ffc_out_fused(
        xl_cm, xg_cm, x1_cm, fu_cm, lfu_cm,
        params["w_l2l"], params["w_g2l"], params["w_l2g"],
        params["st"]["w_conv2"])

    out_xl = jnp.transpose(out_xl_cm.reshape(-1, n, h, w), (1, 0, 2, 3))
    out_xg = jnp.transpose(out_xg_cm.reshape(-1, n, h, w), (1, 0, 2, 3))
    return out_xl, out_xg


# ----------------------------- pure-JAX reference ---------------------------

def _ref_conv1x1(x, w):
    return jnp.einsum("nchw,oc->nohw", x, w, precision=jax.lax.Precision.HIGHEST)


def _ref_bn_relu(x, g, b):
    mean = jnp.mean(x, axis=(0, 2, 3), keepdims=True)
    var = jnp.mean((x - mean) ** 2, axis=(0, 2, 3), keepdims=True)
    y = (x - mean) / jnp.sqrt(var + _EPS)
    y = y * g.reshape(1, -1, 1, 1) + b.reshape(1, -1, 1, 1)
    return jnp.maximum(y, 0.0)


def _ref_fourier_unit(x, w, g, b):
    n, c, h, wd = x.shape
    f = jnp.fft.rfft2(x, s=(h, wd), axes=(2, 3), norm="ortho")
    fr = jnp.concatenate([f.real, f.imag], axis=1)
    y = _ref_bn_relu(_ref_conv1x1(fr, w), g, b)
    re, im = jnp.split(y, 2, axis=1)
    return jnp.fft.irfft2(re + 1j * im, s=(h, wd), axes=(2, 3), norm="ortho")


def _ref_spectral(x, p):
    x1 = _ref_bn_relu(_ref_conv1x1(x, p["w_conv1"]), p["bn1_g"], p["bn1_b"])
    out = _ref_fourier_unit(x1, p["fu_w"], p["fu_bn_g"], p["fu_bn_b"])
    ch = x1.shape[1]
    xs = jnp.concatenate(jnp.split(x1[:, :ch // 4], 2, axis=2), axis=1)
    xs = jnp.concatenate(jnp.split(xs, 2, axis=3), axis=1)
    xs = _ref_fourier_unit(xs, p["lfu_w"], p["lfu_bn_g"], p["lfu_bn_b"])
    xs = jnp.tile(xs, (1, 1, 2, 2))
    return _ref_conv1x1(x1 + out + xs, p["w_conv2"])


def _ref_ffc(x_l, x_g, params):
    out_xl = _ref_conv1x1(x_l, params["w_l2l"]) + _ref_conv1x1(x_g, params["w_g2l"])
    out_xg = _ref_conv1x1(x_l, params["w_l2g"]) + _ref_spectral(x_g, params["st"])
    return out_xl, out_xg


# ----------------------------------- main ------------------------------------

if __name__ == "__main__":
    key = jax.random.PRNGKey(0)
    keys = iter(jax.random.split(key, 32))

    N, H, W = 2, 16, 16
    in_cl = in_cg = 8     # in_channels=16, ratio_gin=0.5
    out_cl = out_cg = 8   # out_channels=16, ratio_gout=0.5
    c_half = out_cg // 2  # SpectralTransform hidden width

    def w_init(k, cout, cin):
        return 0.2 * jax.random.normal(k, (cout, cin), jnp.float32)

    params = {
        "w_l2l": w_init(next(keys), out_cl, in_cl),
        "w_g2l": w_init(next(keys), out_cl, in_cg),
        "w_l2g": w_init(next(keys), out_cg, in_cl),
        "st": {
            "w_conv1": w_init(next(keys), c_half, in_cg),
            "bn1_g": 1.0 + 0.1 * jax.random.normal(next(keys), (c_half,), jnp.float32),
            "bn1_b": 0.1 * jax.random.normal(next(keys), (c_half,), jnp.float32),
            "fu_w": w_init(next(keys), 2 * c_half, 2 * c_half),
            "fu_bn_g": 1.0 + 0.1 * jax.random.normal(next(keys), (2 * c_half,), jnp.float32),
            "fu_bn_b": 0.1 * jax.random.normal(next(keys), (2 * c_half,), jnp.float32),
            "lfu_w": w_init(next(keys), 2 * c_half, 2 * c_half),
            "lfu_bn_g": 1.0 + 0.1 * jax.random.normal(next(keys), (2 * c_half,), jnp.float32),
            "lfu_bn_b": 0.1 * jax.random.normal(next(keys), (2 * c_half,), jnp.float32),
            "w_conv2": w_init(next(keys), out_cg, c_half),
        },
    }

    x_l = jax.random.normal(next(keys), (N, in_cl, H, W), jnp.float32)
    x_g = jax.random.normal(next(keys), (N, in_cg, H, W), jnp.float32)

    out_xl, out_xg = jax.jit(ffc_forward)(x_l, x_g, params)
    jax.block_until_ready((out_xl, out_xg))

    assert out_xl.shape == (N, out_cl, H, W)
    assert out_xg.shape == (N, out_cg, H, W)

    ref_xl, ref_xg = _ref_ffc(x_l, x_g, params)
    # bf16 MXU operands (f32 accumulation) => slightly looser absolute floor.
    assert jnp.allclose(out_xl, ref_xl, atol=5e-2, rtol=2e-2)
    assert jnp.allclose(out_xg, ref_xg, atol=5e-2, rtol=2e-2)

    print("KERNEL_OK")
</pallas_src>

<mosaic_0001>
module attributes {stable_mosaic.version = 11 : i64} {
  func.func @_conv_bn_relu_kernel(%arg0: memref<8x512xf32, #tpu.memory_space<vmem>>, %arg1: memref<4x8xf32, #tpu.memory_space<vmem>>, %arg2: memref<4x1xf32, #tpu.memory_space<vmem>>, %arg3: memref<4x1xf32, #tpu.memory_space<vmem>>, %arg4: memref<4x512xf32, #tpu.memory_space<vmem>>) attributes {dimension_semantics = [], scalar_prefetch = 0 : i64, scratch_operands = 0 : i64, tpu.core_type = #tpu.core_type<tc>} {
    %c0 = arith.constant 0 : index
    %c0_0 = arith.constant 0 : index
    %0 = vector.load %arg1[%c0, %c0_0] : memref<4x8xf32, #tpu.memory_space<vmem>>, vector<4x8xf32>
    %1 = arith.truncf %0 : vector<4x8xf32> to vector<4x8xbf16>
    %c0_1 = arith.constant 0 : index
    %c0_2 = arith.constant 0 : index
    %2 = vector.load %arg0[%c0_1, %c0_2] : memref<8x512xf32, #tpu.memory_space<vmem>>, vector<8x512xf32>
    %3 = arith.truncf %2 : vector<8x512xf32> to vector<8x512xbf16>
    %cst = arith.constant dense<0.000000e+00> : vector<4x512xf32>
    %4 = tpu.matmul %1, %3, %cst {dimension_numbers = #tpu.dot_dimension_numbers<[1], [0], [0], [1], [0, 0, 1, 1], [], []>} : vector<4x8xbf16>, vector<8x512xbf16>, vector<4x512xf32> -> vector<4x512xf32>
    %cst_3 = arith.constant dense<0.000000e+00> : vector<4xf32>
    %5 = vector.multi_reduction <add>, %4, %cst_3 [1] : vector<4x512xf32> to vector<4xf32>
    %6 = vector.shape_cast %5 : vector<4xf32> to vector<4x1xf32>
    %7 = arith.mulf %4, %4 : vector<4x512xf32>
    %cst_4 = arith.constant dense<0.000000e+00> : vector<4xf32>
    %8 = vector.multi_reduction <add>, %7, %cst_4 [1] : vector<4x512xf32> to vector<4xf32>
    %9 = vector.shape_cast %8 : vector<4xf32> to vector<4x1xf32>
    %cst_5 = arith.constant 0.001953125 : f32
    %10 = vector.broadcast %cst_5 : f32 to vector<4x1xf32>
    %11 = arith.mulf %6, %10 : vector<4x1xf32>
    %cst_6 = arith.constant 0.001953125 : f32
    %12 = vector.broadcast %cst_6 : f32 to vector<4x1xf32>
    %13 = arith.mulf %9, %12 : vector<4x1xf32>
    %14 = arith.mulf %11, %11 : vector<4x1xf32>
    %15 = arith.subf %13, %14 : vector<4x1xf32>
    %cst_7 = arith.constant 9.99999974E-6 : f32
    %16 = vector.broadcast %cst_7 : f32 to vector<4x1xf32>
    %17 = arith.addf %15, %16 : vector<4x1xf32>
    %18 = math.rsqrt %17 : vector<4x1xf32>
    %c0_8 = arith.constant 0 : index
    %c0_9 = arith.constant 0 : index
    %19 = vector.load %arg2[%c0_8, %c0_9] : memref<4x1xf32, #tpu.memory_space<vmem>>, vector<4x1xf32>
    %20 = arith.mulf %18, %19 : vector<4x1xf32>
    %21 = vector.broadcast %11 : vector<4x1xf32> to vector<4x512xf32>
    %22 = arith.subf %4, %21 : vector<4x512xf32>
    %23 = vector.broadcast %20 : vector<4x1xf32> to vector<4x512xf32>
    %24 = arith.mulf %22, %23 : vector<4x512xf32>
    %c0_10 = arith.constant 0 : index
    %c0_11 = arith.constant 0 : index
    %25 = vector.load %arg3[%c0_10, %c0_11] : memref<4x1xf32, #tpu.memory_space<vmem>>, vector<4x1xf32>
    %26 = vector.broadcast %25 : vector<4x1xf32> to vector<4x512xf32>
    %27 = arith.addf %24, %26 : vector<4x512xf32>
    %cst_12 = arith.constant 0.000000e+00 : f32
    %28 = vector.broadcast %cst_12 : f32 to vector<4x512xf32>
    %29 = arith.maximumf %27, %28 : vector<4x512xf32>
    %c0_13 = arith.constant 0 : index
    %c0_14 = arith.constant 0 : index
    %30 = vector.load %arg4[%c0_13, %c0_14] : memref<4x512xf32, #tpu.memory_space<vmem>>, vector<4x512xf32>
    tpu.vector_store %arg4[%c0_13, %c0_14], %29 {strides = array<i32>} : memref<4x512xf32, #tpu.memory_space<vmem>>, vector<4x512xf32>,
    return
  }
}

module attributes {stable_mosaic.version = 11 : i64} {
  func.func @_fu_conv_bn_relu_kernel(%arg0: memref<4x128xf32, #tpu.memory_space<vmem>>, %arg1: memref<4x128xf32, #tpu.memory_space<vmem>>, %arg2: memref<8x4xf32, #tpu.memory_space<vmem>>, %arg3: memref<8x4xf32, #tpu.memory_space<vmem>>, %arg4: memref<8x1xf32, #tpu.memory_space<vmem>>, %arg5: memref<8x1xf32, #tpu.memory_space<vmem>>, %arg6: memref<8x128xf32, #tpu.memory_space<vmem>>) attributes {dimension_semantics = [], scalar_prefetch = 0 : i64, scratch_operands = 0 : i64, tpu.core_type = #tpu.core_type<tc>} {
    %c0 = arith.constant 0 : index
    %c0_0 = arith.constant 0 : index
    %0 = vector.load %arg2[%c0, %c0_0] : memref<8x4xf32, #tpu.memory_space<vmem>>, vector<8x4xf32>
    %1 = arith.truncf %0 : vector<8x4xf32> to vector<8x4xbf16>
    %c0_1 = arith.constant 0 : index
    %c0_2 = arith.constant 0 : index
    %2 = vector.load %arg0[%c0_1, %c0_2] : memref<4x128xf32, #tpu.memory_space<vmem>>, vector<4x128xf32>
    %3 = arith.truncf %2 : vector<4x128xf32> to vector<4x128xbf16>
    %cst = arith.constant dense<0.000000e+00> : vector<8x128xf32>
    %4 = tpu.matmul %1, %3, %cst {dimension_numbers = #tpu.dot_dimension_numbers<[1], [0], [0], [1], [0, 0, 1, 1], [], []>} : vector<8x4xbf16>, vector<4x128xbf16>, vector<8x128xf32> -> vector<8x128xf32>
    %c0_3 = arith.constant 0 : index
    %c0_4 = arith.constant 0 : index
    %5 = vector.load %arg3[%c0_3, %c0_4] : memref<8x4xf32, #tpu.memory_space<vmem>>, vector<8x4xf32>
    %6 = arith.truncf %5 : vector<8x4xf32> to vector<8x4xbf16>
    %c0_5 = arith.constant 0 : index
    %c0_6 = arith.constant 0 : index
    %7 = vector.load %arg1[%c0_5, %c0_6] : memref<4x128xf32, #tpu.memory_space<vmem>>, vector<4x128xf32>
    %8 = arith.truncf %7 : vector<4x128xf32> to vector<4x128xbf16>
    %cst_7 = arith.constant dense<0.000000e+00> : vector<8x128xf32>
    %9 = tpu.matmul %6, %8, %cst_7 {dimension_numbers = #tpu.dot_dimension_numbers<[1], [0], [0], [1], [0, 0, 1, 1], [], []>} : vector<8x4xbf16>, vector<4x128xbf16>, vector<8x128xf32> -> vector<8x128xf32>
    %10 = arith.addf %4, %9 : vector<8x128xf32>
    %cst_8 = arith.constant dense<0.000000e+00> : vector<8xf32>
    %11 = vector.multi_reduction <add>, %10, %cst_8 [1] : vector<8x128xf32> to vector<8xf32>
    %12 = vector.shape_cast %11 : vector<8xf32> to vector<8x1xf32>
    %13 = arith.mulf %10, %10 : vector<8x128xf32>
    %cst_9 = arith.constant dense<0.000000e+00> : vector<8xf32>
    %14 = vector.multi_reduction <add>, %13, %cst_9 [1] : vector<8x128xf32> to vector<8xf32>
    %15 = vector.shape_cast %14 : vector<8xf32> to vector<8x1xf32>
    %cst_10 = arith.constant 1.250000e-02 : f32
    %16 = vector.broadcast %cst_10 : f32 to vector<8x1xf32>
    %17 = arith.mulf %12, %16 : vector<8x1xf32>
    %cst_11 = arith.constant 1.250000e-02 : f32
    %18 = vector.broadcast %cst_11 : f32 to vector<8x1xf32>
    %19 = arith.mulf %15, %18 : vector<8x1xf32>
    %20 = arith.mulf %17, %17 : vector<8x1xf32>
    %21 = arith.subf %19, %20 : vector<8x1xf32>
    %cst_12 = arith.constant 9.99999974E-6 : f32
    %22 = vector.broadcast %cst_12 : f32 to vector<8x1xf32>
    %23 = arith.addf %21, %22 : vector<8x1xf32>
    %24 = math.rsqrt %23 : vector<8x1xf32>
    %c0_13 = arith.constant 0 : index
    %c0_14 = arith.constant 0 : index
    %25 = vector.load %arg4[%c0_13, %c0_14] : memref<8x1xf32, #tpu.memory_space<vmem>>, vector<8x1xf32>
    %26 = arith.mulf %24, %25 : vector<8x1xf32>
    %27 = vector.broadcast %17 : vector<8x1xf32> to vector<8x128xf32>
    %28 = arith.subf %10, %27 : vector<8x128xf32>
    %29 = vector.broadcast %26 : vector<8x1xf32> to vector<8x128xf32>
    %30 = arith.mulf %28, %29 : vector<8x128xf32>
    %c0_15 = arith.constant 0 : index
    %c0_16 = arith.constant 0 : index
    %31 = vector.load %arg5[%c0_15, %c0_16] : memref<8x1xf32, #tpu.memory_space<vmem>>, vector<8x1xf32>
    %32 = vector.broadcast %31 : vector<8x1xf32> to vector<8x128xf32>
    %33 = arith.addf %30, %32 : vector<8x128xf32>
    %cst_17 = arith.constant 0.000000e+00 : f32
    %34 = vector.broadcast %cst_17 : f32 to vector<8x128xf32>
    %35 = arith.maximumf %33, %34 : vector<8x128xf32>
    %c0_18 = arith.constant 0 : index
    %c0_19 = arith.constant 0 : index
    %36 = vector.load %arg6[%c0_18, %c0_19] : memref<8x128xf32, #tpu.memory_space<vmem>>, vector<8x128xf32>
    tpu.vector_store %arg6[%c0_18, %c0_19], %35 {strides = array<i32>} : memref<8x128xf32, #tpu.memory_space<vmem>>, vector<8x128xf32>,
    return
  }
}

module attributes {stable_mosaic.version = 11 : i64} {
  func.func @_fu_conv_bn_relu_kernel(%arg0: memref<4x384xf32, #tpu.memory_space<vmem>>, %arg1: memref<4x384xf32, #tpu.memory_space<vmem>>, %arg2: memref<8x4xf32, #tpu.memory_space<vmem>>, %arg3: memref<8x4xf32, #tpu.memory_space<vmem>>, %arg4: memref<8x1xf32, #tpu.memory_space<vmem>>, %arg5: memref<8x1xf32, #tpu.memory_space<vmem>>, %arg6: memref<8x384xf32, #tpu.memory_space<vmem>>) attributes {dimension_semantics = [], scalar_prefetch = 0 : i64, scratch_operands = 0 : i64, tpu.core_type = #tpu.core_type<tc>} {
    %c0 = arith.constant 0 : index
    %c0_0 = arith.constant 0 : index
    %0 = vector.load %arg2[%c0, %c0_0] : memref<8x4xf32, #tpu.memory_space<vmem>>, vector<8x4xf32>
    %1 = arith.truncf %0 : vector<8x4xf32> to vector<8x4xbf16>
    %c0_1 = arith.constant 0 : index
    %c0_2 = arith.constant 0 : index
    %2 = vector.load %arg0[%c0_1, %c0_2] : memref<4x384xf32, #tpu.memory_space<vmem>>, vector<4x384xf32>
    %3 = arith.truncf %2 : vector<4x384xf32> to vector<4x384xbf16>
    %cst = arith.constant dense<0.000000e+00> : vector<8x384xf32>
    %4 = tpu.matmul %1, %3, %cst {dimension_numbers = #tpu.dot_dimension_numbers<[1], [0], [0], [1], [0, 0, 1, 1], [], []>} : vector<8x4xbf16>, vector<4x384xbf16>, vector<8x384xf32> -> vector<8x384xf32>
    %c0_3 = arith.constant 0 : index
    %c0_4 = arith.constant 0 : index
    %5 = vector.load %arg3[%c0_3, %c0_4] : memref<8x4xf32, #tpu.memory_space<vmem>>, vector<8x4xf32>
    %6 = arith.truncf %5 : vector<8x4xf32> to vector<8x4xbf16>
    %c0_5 = arith.constant 0 : index
    %c0_6 = arith.constant 0 : index
    %7 = vector.load %arg1[%c0_5, %c0_6] : memref<4x384xf32, #tpu.memory_space<vmem>>, vector<4x384xf32>
    %8 = arith.truncf %7 : vector<4x384xf32> to vector<4x384xbf16>
    %cst_7 = arith.constant dense<0.000000e+00> : vector<8x384xf32>
    %9 = tpu.matmul %6, %8, %cst_7 {dimension_numbers = #tpu.dot_dimension_numbers<[1], [0], [0], [1], [0, 0, 1, 1], [], []>} : vector<8x4xbf16>, vector<4x384xbf16>, vector<8x384xf32> -> vector<8x384xf32>
    %10 = arith.addf %4, %9 : vector<8x384xf32>
    %cst_8 = arith.constant dense<0.000000e+00> : vector<8xf32>
    %11 = vector.multi_reduction <add>, %10, %cst_8 [1] : vector<8x384xf32> to vector<8xf32>
    %12 = vector.shape_cast %11 : vector<8xf32> to vector<8x1xf32>
    %13 = arith.mulf %10, %10 : vector<8x384xf32>
    %cst_9 = arith.constant dense<0.000000e+00> : vector<8xf32>
    %14 = vector.multi_reduction <add>, %13, %cst_9 [1] : vector<8x384xf32> to vector<8xf32>
    %15 = vector.shape_cast %14 : vector<8xf32> to vector<8x1xf32>
    %cst_10 = arith.constant 0.00347222225 : f32
    %16 = vector.broadcast %cst_10 : f32 to vector<8x1xf32>
    %17 = arith.mulf %12, %16 : vector<8x1xf32>
    %cst_11 = arith.constant 0.00347222225 : f32
    %18 = vector.broadcast %cst_11 : f32 to vector<8x1xf32>
    %19 = arith.mulf %15, %18 : vector<8x1xf32>
    %20 = arith.mulf %17, %17 : vector<8x1xf32>
    %21 = arith.subf %19, %20 : vector<8x1xf32>
    %cst_12 = arith.constant 9.99999974E-6 : f32
    %22 = vector.broadcast %cst_12 : f32 to vector<8x1xf32>
    %23 = arith.addf %21, %22 : vector<8x1xf32>
    %24 = math.rsqrt %23 : vector<8x1xf32>
    %c0_13 = arith.constant 0 : index
    %c0_14 = arith.constant 0 : index
    %25 = vector.load %arg4[%c0_13, %c0_14] : memref<8x1xf32, #tpu.memory_space<vmem>>, vector<8x1xf32>
    %26 = arith.mulf %24, %25 : vector<8x1xf32>
    %27 = vector.broadcast %17 : vector<8x1xf32> to vector<8x384xf32>
    %28 = arith.subf %10, %27 : vector<8x384xf32>
    %29 = vector.broadcast %26 : vector<8x1xf32> to vector<8x384xf32>
    %30 = arith.mulf %28, %29 : vector<8x384xf32>
    %c0_15 = arith.constant 0 : index
    %c0_16 = arith.constant 0 : index
    %31 = vector.load %arg5[%c0_15, %c0_16] : memref<8x1xf32, #tpu.memory_space<vmem>>, vector<8x1xf32>
    %32 = vector.broadcast %31 : vector<8x1xf32> to vector<8x384xf32>
    %33 = arith.addf %30, %32 : vector<8x384xf32>
    %cst_17 = arith.constant 0.000000e+00 : f32
    %34 = vector.broadcast %cst_17 : f32 to vector<8x384xf32>
    %35 = arith.maximumf %33, %34 : vector<8x384xf32>
    %c0_18 = arith.constant 0 : index
    %c0_19 = arith.constant 0 : index
    %36 = vector.load %arg6[%c0_18, %c0_19] : memref<8x384xf32, #tpu.memory_space<vmem>>, vector<8x384xf32>
    tpu.vector_store %arg6[%c0_18, %c0_19], %35 {strides = array<i32>} : memref<8x384xf32, #tpu.memory_space<vmem>>, vector<8x384xf32>,
    return
  }
}

module attributes {stable_mosaic.version = 11 : i64} {
  func.func @_ffc_out_kernel(%arg0: i32, %arg1: memref<8x512xf32, #tpu.memory_space<vmem>>, %arg2: memref<8x512xf32, #tpu.memory_space<vmem>>, %arg3: memref<4x512xf32, #tpu.memory_space<vmem>>, %arg4: memref<4x512xf32, #tpu.memory_space<vmem>>, %arg5: memref<4x512xf32, #tpu.memory_space<vmem>>, %arg6: memref<8x8xf32, #tpu.memory_space<vmem>>, %arg7: memref<8x8xf32, #tpu.memory_space<vmem>>, %arg8: memref<8x8xf32, #tpu.memory_space<vmem>>, %arg9: memref<8x4xf32, #tpu.memory_space<vmem>>, %arg10: memref<8x512xf32, #tpu.memory_space<vmem>>, %arg11: memref<8x512xf32, #tpu.memory_space<vmem>>) attributes {dimension_semantics = [#tpu.dimension_semantics<parallel>], iteration_bounds = array<i64: 1>, scalar_prefetch = 0 : i64, scratch_operands = 0 : i64, tpu.core_type = #tpu.core_type<tc>, window_params = [{transform_indices = @transform_0, window_bounds = array<i64: 8, 512>}, {transform_indices = @transform_1, window_bounds = array<i64: 8, 512>}, {transform_indices = @transform_2, window_bounds = array<i64: 4, 512>}, {transform_indices = @transform_3, window_bounds = array<i64: 4, 512>}, {transform_indices = @transform_4, window_bounds = array<i64: 4, 512>}, {pipeline_mode = #tpu.pipeline_mode<synchronous>, transform_indices = @transform_5, window_bounds = array<i64: 8, 8>}, {pipeline_mode = #tpu.pipeline_mode<synchronous>, transform_indices = @transform_6, window_bounds = array<i64: 8, 8>}, {pipeline_mode = #tpu.pipeline_mode<synchronous>, transform_indices = @transform_7, window_bounds = array<i64: 8, 8>}, {pipeline_mode = #tpu.pipeline_mode<synchronous>, transform_indices = @transform_8, window_bounds = array<i64: 8, 4>}, {transform_indices = @transform_9, window_bounds = array<i64: 8, 512>}, {transform_indices = @transform_10, window_bounds = array<i64: 8, 512>}]} {
    %c0 = arith.constant 0 : index
    %c0_0 = arith.constant 0 : index
    %0 = vector.load %arg1[%c0, %c0_0] : memref<8x512xf32, #tpu.memory_space<vmem>>, vector<8x512xf32>
    %1 = arith.truncf %0 : vector<8x512xf32> to vector<8x512xbf16>
    %c0_1 = arith.constant 0 : index
    %c0_2 = arith.constant 0 : index
    %2 = vector.load %arg2[%c0_1, %c0_2] : memref<8x512xf32, #tpu.memory_space<vmem>>, vector<8x512xf32>
    %3 = arith.truncf %2 : vector<8x512xf32> to vector<8x512xbf16>
    %c0_3 = arith.constant 0 : index
    %c0_4 = arith.constant 0 : index
    %4 = vector.load %arg3[%c0_3, %c0_4] : memref<4x512xf32, #tpu.memory_space<vmem>>, vector<4x512xf32>
    %c0_5 = arith.constant 0 : index
    %c0_6 = arith.constant 0 : index
    %5 = vector.load %arg4[%c0_5, %c0_6] : memref<4x512xf32, #tpu.memory_space<vmem>>, vector<4x512xf32>
    %6 = arith.addf %4, %5 : vector<4x512xf32>
    %c0_7 = arith.constant 0 : index
    %c0_8 = arith.constant 0 : index
    %7 = vector.load %arg5[%c0_7, %c0_8] : memref<4x512xf32, #tpu.memory_space<vmem>>, vector<4x512xf32>
    %8 = arith.addf %6, %7 : vector<4x512xf32>
    %9 = arith.truncf %8 : vector<4x512xf32> to vector<4x512xbf16>
    %c0_9 = arith.constant 0 : index
    %c0_10 = arith.constant 0 : index
    %10 = vector.load %arg6[%c0_9, %c0_10] : memref<8x8xf32, #tpu.memory_space<vmem>>, vector<8x8xf32>
    %11 = arith.truncf %10 : vector<8x8xf32> to vector<8x8xbf16>
    %cst = arith.constant dense<0.000000e+00> : vector<8x512xf32>
    %12 = tpu.matmul %11, %1, %cst {dimension_numbers = #tpu.dot_dimension_numbers<[1], [0], [0], [1], [0, 0, 1, 1], [], []>} : vector<8x8xbf16>, vector<8x512xbf16>, vector<8x512xf32> -> vector<8x512xf32>
    %c0_11 = arith.constant 0 : index
    %c0_12 = arith.constant 0 : index
    %13 = vector.load %arg7[%c0_11, %c0_12] : memref<8x8xf32, #tpu.memory_space<vmem>>, vector<8x8xf32>
    %14 = arith.truncf %13 : vector<8x8xf32> to vector<8x8xbf16>
    %cst_13 = arith.constant dense<0.000000e+00> : vector<8x512xf32>
    %15 = tpu.matmul %14, %3, %cst_13 {dimension_numbers = #tpu.dot_dimension_numbers<[1], [0], [0], [1], [0, 0, 1, 1], [], []>} : vector<8x8xbf16>, vector<8x512xbf16>, vector<8x512xf32> -> vector<8x512xf32>
    %16 = arith.addf %12, %15 : vector<8x512xf32>
    %c0_14 = arith.constant 0 : index
    %c0_15 = arith.constant 0 : index
    %17 = vector.load %arg10[%c0_14, %c0_15] : memref<8x512xf32, #tpu.memory_space<vmem>>, vector<8x512xf32>
    tpu.vector_store %arg10[%c0_14, %c0_15], %16 {strides = array<i32>} : memref<8x512xf32, #tpu.memory_space<vmem>>, vector<8x512xf32>,
    %c0_16 = arith.constant 0 : index
    %c0_17 = arith.constant 0 : index
    %18 = vector.load %arg8[%c0_16, %c0_17] : memref<8x8xf32, #tpu.memory_space<vmem>>, vector<8x8xf32>
    %19 = arith.truncf %18 : vector<8x8xf32> to vector<8x8xbf16>
    %cst_18 = arith.constant dense<0.000000e+00> : vector<8x512xf32>
    %20 = tpu.matmul %19, %1, %cst_18 {dimension_numbers = #tpu.dot_dimension_numbers<[1], [0], [0], [1], [0, 0, 1, 1], [], []>} : vector<8x8xbf16>, vector<8x512xbf16>, vector<8x512xf32> -> vector<8x512xf32>
    %c0_19 = arith.constant 0 : index
    %c0_20 = arith.constant 0 : index
    %21 = vector.load %arg9[%c0_19, %c0_20] : memref<8x4xf32, #tpu.memory_space<vmem>>, vector<8x4xf32>
    %22 = arith.truncf %21 : vector<8x4xf32> to vector<8x4xbf16>
    %cst_21 = arith.constant dense<0.000000e+00> : vector<8x512xf32>
    %23 = tpu.matmul %22, %9, %cst_21 {dimension_numbers = #tpu.dot_dimension_numbers<[1], [0], [0], [1], [0, 0, 1, 1], [], []>} : vector<8x4xbf16>, vector<4x512xbf16>, vector<8x512xf32> -> vector<8x512xf32>
    %24 = arith.addf %20, %23 : vector<8x512xf32>
    %c0_22 = arith.constant 0 : index
    %c0_23 = arith.constant 0 : index
    %25 = vector.load %arg11[%c0_22, %c0_23] : memref<8x512xf32, #tpu.memory_space<vmem>>, vector<8x512xf32>
    tpu.vector_store %arg11[%c0_22, %c0_23], %24 {strides = array<i32>} : memref<8x512xf32, #tpu.memory_space<vmem>>, vector<8x512xf32>,
    return
  }
  func.func @transform_0(%arg0: i32) -> (i32, i32) {
    %c0_i32 = arith.constant 0 : i32
    %c0_i32_0 = arith.constant 0 : i32
    return %c0_i32, %arg0 : i32, i32
  }
  func.func @transform_1(%arg0: i32) -> (i32, i32) {
    %c0_i32 = arith.constant 0 : i32
    %c0_i32_0 = arith.constant 0 : i32
    return %c0_i32, %arg0 : i32, i32
  }
  func.func @transform_2(%arg0: i32) -> (i32, i32) {
    %c0_i32 = arith.constant 0 : i32
    %c0_i32_0 = arith.constant 0 : i32
    return %c0_i32, %arg0 : i32, i32
  }
  func.func @transform_3(%arg0: i32) -> (i32, i32) {
    %c0_i32 = arith.constant 0 : i32
    %c0_i32_0 = arith.constant 0 : i32
    return %c0_i32, %arg0 : i32, i32
  }
  func.func @transform_4(%arg0: i32) -> (i32, i32) {
    %c0_i32 = arith.constant 0 : i32
    %c0_i32_0 = arith.constant 0 : i32
    return %c0_i32, %arg0 : i32, i32
  }
  func.func @transform_5(%arg0: i32) -> (i32, i32) {
    %c0_i32 = arith.constant 0 : i32
    %c0_i32_0 = arith.constant 0 : i32
    %c0_i32_1 = arith.constant 0 : i32
    return %c0_i32, %c0_i32_0 : i32, i32
  }
  func.func @transform_6(%arg0: i32) -> (i32, i32) {
    %c0_i32 = arith.constant 0 : i32
    %c0_i32_0 = arith.constant 0 : i32
    %c0_i32_1 = arith.constant 0 : i32
    return %c0_i32, %c0_i32_0 : i32, i32
  }
  func.func @transform_7(%arg0: i32) -> (i32, i32) {
    %c0_i32 = arith.constant 0 : i32
    %c0_i32_0 = arith.constant 0 : i32
    %c0_i32_1 = arith.constant 0 : i32
    return %c0_i32, %c0_i32_0 : i32, i32
  }
  func.func @transform_8(%arg0: i32) -> (i32, i32) {
    %c0_i32 = arith.constant 0 : i32
    %c0_i32_0 = arith.constant 0 : i32
    %c0_i32_1 = arith.constant 0 : i32
    return %c0_i32, %c0_i32_0 : i32, i32
  }
  func.func @transform_9(%arg0: i32) -> (i32, i32) {
    %c0_i32 = arith.constant 0 : i32
    %c0_i32_0 = arith.constant 0 : i32
    return %c0_i32, %arg0 : i32, i32
  }
  func.func @transform_10(%arg0: i32) -> (i32, i32) {
    %c0_i32 = arith.constant 0 : i32
    %c0_i32_0 = arith.constant 0 : i32
    return %c0_i32, %arg0 : i32, i32
  }
}

</mosaic_0001>

<bundles_post_ra>
// kernel: ffc_forward.4
= control target key start
LH: loop header
LB: loop body
LE: loop exit
PB: predicated region body
PF: predicated region fallthrough
CT: control target
= control target key end

     0   :  { %vm32_vm0 = vcmask 1043456   ;;  %v207_v3 = vmov 0   ;;  %vm28_vm1 = vcmask 64512   ;;  %s272_s0 = inlined_call_operand.vmem [shape: f32[8,512], index: 0, kind: input, shape index: {}]   ;;  %s273_s1 = inlined_call_operand.vmem [shape: f32[4,8], index: 1, kind: input, shape index: {}]   ;;  %s274_s2 = inlined_call_operand.vmem [shape: f32[4,1], index: 2, kind: input, shape index: {}]   ;;  %s275_s3 = inlined_call_operand.vmem [shape: f32[4,1], index: 3, kind: input, shape index: {}]   ;;  %s276_s4 = inlined_call_operand.vmem [shape: f32[4,512], index: 4, kind: output, shape index: {}]  }
   0x1   :  { %v21_v0 = vld [vmem:[%s272_s0 + $0x8] sm:$0xff]  ;;  %v23_v1 = vld [vmem:[%s272_s0 + $0x18] sm:$0xff]  ;;  %v20_v2 = vld [vmem:[%s272_s0] sm:$0xff]  ;;  %77 = vmatprep.mubr.bf16.mxu0 %v207_v3  ;;  %118 = vmatprep.mubr.bf16.mxu1 %v207_v3 }
   0x2   :  { %v25_v4 = vpack.c.bf16 %v21_v0, %v21_v0  ;;  %v27_v5 = vpack.c.bf16 %v23_v1, %v23_v1  ;;  %v24_v6 = vpack.c.bf16 %v20_v2, %v20_v2  ;;  %v22_v7 = vld [vmem:[%s272_s0 + $0x10] sm:$0xff]  ;;  %v18_v8 = vld [vmem:[%s273_s1] sm:$0xf]  ;;  %203 = vset.pattern.permute.xlu1 %v207_v3  ;;  %204 = vset.pattern.permute.xlu0 %v207_v3 }
   0x3   :  { %v26_v9 = vpack.c.bf16 %v22_v7, %v22_v7  ;;  %v19_v11 = vpack.c.bf16 %v18_v8, %v18_v8  ;;  %v155_v46 = vld [vmem:[%s274_s2] sm:$0xf] }
   0x4   :  { %198 = vmatprep.subr.msk.bf16.mxu0 %vm32_vm0, %v25_v4  ;;  %200 = vmatprep.subr.msk.bf16.mxu1 %vm32_vm0, %v27_v5  ;;  %v34_v10 = vsel %vm32_vm0, %v24_v6, 0  ;;  %v170_v49 = vld [vmem:[%s275_s3] sm:$0xf] }
   0x5   :  { %60 = vmatpush1.bf16.msra.mxu0 %v34_v10  ;;  %v40_v12 = vsel %vm32_vm0, %v26_v9, 0 }
   0x6   :  { %101 = vmatpush1.bf16.msra.mxu1 %v40_v12 }
   0x8   :  { %199 = vmatmul.mubr.msk.bf16.vlgmr.msra.gmra.mxu0 %vm28_vm1, %v19_v11 }
   0x9   :  { %201 = vmatmul.mubr.msk.bf16.vlgmr.msra.gmra.mxu1 %vm28_vm1, %v19_v11 }
  0xc8   :  { %v79_v13 = vpop.f32.mrf.mxu0 }
  0xc9   :  { %v136_v14 = vmul.f32 %v79_v13, %v79_v13  ;;  %v120_v15 = vpop.f32.mrf.mxu1  ;;  %v127_v18 = vsel %vm32_vm0, %v79_v13, 0.0 }
  0xca   :  { %v138_v16 = vmul.f32 %v120_v15, %v120_v15  ;;  %v81_v17 = vpop.f32.mrf.mxu0  ;;  %v130_v22 = vsel %vm32_vm0, %v120_v15, 0.0 }
  0xcb   :  { %v128_v19 = vsel %vm32_vm0, %v81_v17, 0.0  ;;  %v137_v20 = vmul.f32 %v81_v17, %v81_v17  ;;  %v122_v21 = vpop.f32.mrf.mxu1  ;;  %v140_v25 = vsel %vm32_vm0, %v136_v14, 0.0 }
  0xcc   :  { %v83_v23 = vpop.f32.mrf.mxu0  ;;  %v129_v24 = vadd.f32 %v128_v19, %v127_v18  ;;  %v143_v28 = vsel %vm32_vm0, %v138_v16, 0.0  ;;  %v139_v32 = vmul.f32 %v122_v21, %v122_v21  ;;  %v132_v34 = vsel %vm32_vm0, %v122_v21, 0.0 }
  0xcd   :  { %v141_v26 = vsel %vm32_vm0, %v137_v20, 0.0  ;;  %v124_v27 = vpop.f32.mrf.mxu1 }
  0xce   :  { %v84_v29 = vpop.f32.mrf.mxu0  ;;  %v131_v30 = vadd.f32 %v130_v22, %v129_v24  ;;  %v142_v31 = vadd.f32 %v141_v26, %v140_v25  ;;  %v145_v37 = vsel %vm32_vm0, %v139_v32, 0.0 }
  0xcf   :  { %v125_v33 = vpop.f32.mrf.mxu1 }
  0xd0   :  { %v133_v35 = vadd.f32 %v132_v34, %v131_v30  ;;  %v144_v36 = vadd.f32 %v143_v28, %v142_v31 }
  0xd2   :  { %134 = vadd.xlane.f32.xlu0 %v133_v35  ;;  %v146_v38 = vadd.f32 %v145_v37, %v144_v36 }
  0xd6   :  { %147 = vadd.xlane.f32.xlu0 %v146_v38 }
 0x15b   :  { %v135_v39 = vpop.xlane.xlu0 %134 }
 0x15c   :  { %v149_v40 = vmul.f32 0.001953125, %v135_v39 }
 0x15e   :  { %v151_v42 = vmul.f32 %v149_v40, %v149_v40  ;;  %v157_v51 = vsub.f32 %v79_v13, %v149_v40  ;;  %v158_v52 = vsub.f32 %v81_v17, %v149_v40  ;;  %v159_v53 = vsub.f32 %v120_v15, %v149_v40 }
 0x15f   :  { %v148_v41 = vpop.xlane.xlu0 %147  ;;  %v160_v54 = vsub.f32 %v122_v21, %v149_v40 }
 0x160   :  { %v150_v43 = vmul.f32 0.001953125, %v148_v41 }
 0x162   :  { %v152_v44 = vsub.f32 %v150_v43, %v151_v42 }
 0x164   :  { %v153_v45 = vadd.f32 1e-05, %v152_v44 }
 0x166   :  { %205 = vrsqrt.f32 %v153_v45 }
 0x173   :  { %v206_v47 = vpop.eup %205 }
 0x174   :  { %v156_v48 = vmul.f32 %v206_v47, %v155_v46 }
 0x176   :  { %163 = vperm.xlu1 %203, %v156_v48  }
 0x17a   :  { %173 = vperm.xlu1 %203, %v170_v49  }
 0x1f1   :  { %v164_v50 = vpop.permute.xlu1 %163 }
 0x1f2   :  { %v166_v55 = vmul.f32 %v164_v50, %v157_v51  ;;  %v167_v56 = vmul.f32 %v164_v50, %v158_v52  ;;  %v168_v57 = vmul.f32 %v164_v50, %v159_v53  ;;  %v169_v58 = vmul.f32 %v164_v50, %v160_v54 }
 0x1f5   :  { %v174_v59 = vpop.permute.xlu1 %173 }
 0x1f6   :  { %v176_v60 = vadd.f32 %v174_v59, %v166_v55  ;;  %v177_v61 = vadd.f32 %v174_v59, %v167_v56  ;;  %v178_v62 = vadd.f32 %v174_v59, %v168_v57  ;;  %v179_v63 = vadd.f32 %v174_v59, %v169_v58 }
 0x1f8   :  { %v180_v0 = vmax.f32 %v176_v60, 0.0  ;;  %v181_v1 = vmax.f32 %v177_v61, 0.0  ;;  %v182_v2 = vmax.f32 %v178_v62, 0.0  ;;  %v183_v3 = vmax.f32 %v179_v63, 0.0 }
 0x1fa   :  { %v188_v4 = vcombine.low %v180_v0, %v181_v1  ;;  %v189_v5 = vcombine.low %v182_v2, %v183_v3 }
 0x1fc   :  { %192 = vst [vmem:[%s276_s4] sm:$0xff] %v188_v4  ;;  %193 = vst [vmem:[%s276_s4 + $0x8] sm:$0xff] %v189_v5 }

// kernel: ffc_forward.6
= control target key start
LH: loop header
LB: loop body
LE: loop exit
PB: predicated region body
PF: predicated region fallthrough
CT: control target
= control target key end

     0   :  { %v184_v0 = vmov 0.0   ;;  %vm36_vm0 = vcmask 1041408   ;;  %vm185_vm1 = vmmov 0   ;;  %vm32_vm2 = vcmask 31744   ;;  %s243_s1 = inlined_call_operand.vmem [shape: f32[4,128], index: 1, kind: input, shape index: {}]   ;;  %s244_s0 = inlined_call_operand.vmem [shape: f32[4,128], index: 0, kind: input, shape index: {}]   ;;  %s245_s3 = inlined_call_operand.vmem [shape: f32[8,4], index: 3, kind: input, shape index: {}]   ;;  %s246_s2 = inlined_call_operand.vmem [shape: f32[8,4], index: 2, kind: input, shape index: {}]   ;;  %s247_s4 = inlined_call_operand.vmem [shape: f32[8,1], index: 4, kind: input, shape index: {}]   ;;  %s248_s5 = inlined_call_operand.vmem [shape: f32[8,1], index: 5, kind: input, shape index: {}]   ;;  %s249_s6 = inlined_call_operand.vmem [shape: f32[8,128], index: 6, kind: output, shape index: {}]  }
   0x1   :  { %165 = vmatprep.subr.bf16.mxu0 %v184_v0  ;;  %171 = vmatprep.subr.bf16.mxu1 %v184_v0  ;;  %v30_v1 = vld [vmem:[%s243_s1] sm:$0xf]  ;;  %v186_v21 = vmov 0  }
   0x2   :  { %v26_v2 = vld [vmem:[%s244_s0] sm:$0xf]  ;;  %v31_v4 = vpack.c.bf16 %v30_v1, %v30_v1  ;;  %167 = vmatprep.mubr.msk.bf16.mxu0 %vm185_vm1, %v184_v0  ;;  %173 = vmatprep.mubr.msk.bf16.mxu1 %vm185_vm1, %v184_v0 }
   0x3   :  { %v28_v3 = vld [vmem:[%s245_s3] sm:$0xff]  ;;  %v27_v5 = vpack.c.bf16 %v26_v2, %v26_v2  ;;  %180 = vset.pattern.permute.xlu1 %v186_v21  ;;  %181 = vset.pattern.permute.xlu0 %v186_v21 }
   0x4   :  { %v24_v6 = vld [vmem:[%s246_s2] sm:$0xff]  ;;  %v38_v7 = vsel %vm36_vm0, %v31_v4, 0  ;;  %v29_v9 = vpack.c.bf16 %v28_v3, %v28_v3 }
   0x5   :  { %v84_v8 = vsel %vm36_vm0, %v27_v5, 0  ;;  %v25_v10 = vpack.c.bf16 %v24_v6, %v24_v6  ;;  %166 = vmatpush3.bf16.msra.mxu0 %v38_v7  ;;  %v137_v29 = vld [vmem:[%s247_s4] sm:$0xff] }
   0x6   :  { %172 = vmatpush3.bf16.msra.mxu1 %v84_v8  ;;  %v146_v32 = vld [vmem:[%s248_s5] sm:$0xff] }
   0x8   :  { %168 = vmatmul.mubr.msk.bf16.vlgmr.msra.gmra.mxu0 %vm32_vm2, %v29_v9 }
   0x9   :  { %174 = vmatmul.mubr.msk.bf16.vlgmr.msra.gmra.mxu1 %vm32_vm2, %v25_v10 }
  0xc8   :  { %v74_v11 = vpop.f32.mrf.mxu0 }
  0xc9   :  { %v120_v12 = vpop.f32.mrf.mxu1 }
  0xca   :  { %v121_v13 = vadd.f32 %v120_v12, %v74_v11  ;;  %v169_v14 = vpop.f32.mrf.mxu0 }
  0xcb   :  { %v175_v15 = vpop.f32.mrf.mxu1 }
  0xcc   :  { %126 = vadd.xlane.f32.xlu0 %v121_v13  ;;  %v77_v16 = vpop.f32.mrf.mxu0  ;;  %v128_v18 = vmul.f32 %v121_v13, %v121_v13 }
  0xcd   :  { %v123_v17 = vpop.f32.mrf.mxu1 }
  0xce   :  { %v170_v19 = vpop.f32.mrf.mxu0 }
  0xcf   :  { %v176_v20 = vpop.f32.mrf.mxu1 }
  0xd0   :  { %129 = vadd.xlane.f32.xlu0 %v128_v18 }
 0x155   :  { %v127_v22 = vpop.xlane.xlu0 %126 }
 0x156   :  { %v131_v23 = vmul.f32 0.0125, %v127_v22 }
 0x158   :  { %v133_v25 = vmul.f32 %v131_v23, %v131_v23  ;;  %v139_v34 = vsub.f32 %v121_v13, %v131_v23 }
 0x159   :  { %v130_v24 = vpop.xlane.xlu0 %129 }
 0x15a   :  { %v132_v26 = vmul.f32 0.0125, %v130_v24 }
 0x15c   :  { %v134_v27 = vsub.f32 %v132_v26, %v133_v25 }
 0x15e   :  { %v135_v28 = vadd.f32 1e-05, %v134_v27 }
 0x160   :  { %182 = vrsqrt.f32 %v135_v28 }
 0x16d   :  { %v183_v30 = vpop.eup %182 }
 0x16e   :  { %v138_v31 = vmul.f32 %v183_v30, %v137_v29 }
 0x170   :  { %142 = vperm.xlu1 %180, %v138_v31  }
 0x174   :  { %149 = vperm.xlu1 %180, %v146_v32  }
 0x1eb   :  { %v143_v33 = vpop.permute.xlu1 %142 }
 0x1ec   :  { %v145_v35 = vmul.f32 %v143_v33, %v139_v34 }
 0x1ef   :  { %v150_v36 = vpop.permute.xlu1 %149 }
 0x1f0   :  { %v152_v37 = vadd.f32 %v150_v36, %v145_v35 }
 0x1f2   :  { %v153_v38 = vmax.f32 %v152_v37, 0.0 }
 0x1f4   :  { %154 = vst [vmem:[%s249_s6] sm:$0xff] %v153_v38 }

// kernel: ffc_forward.5
= control target key start
LH: loop header
LB: loop body
LE: loop exit
PB: predicated region body
PF: predicated region fallthrough
CT: control target
= control target key end

     0   :  { %v312_v0 = vmov 0.0   ;;  %vm48_vm0 = vcmask 1041408   ;;  %vm313_vm1 = vmmov 0   ;;  %v314_v7 = vmov 0   ;;  %s395_s1 = inlined_call_operand.vmem [shape: f32[4,384], index: 1, kind: input, shape index: {}]   ;;  %s396_s3 = inlined_call_operand.vmem [shape: f32[8,4], index: 3, kind: input, shape index: {}]   ;;  %s397_s0 = inlined_call_operand.vmem [shape: f32[4,384], index: 0, kind: input, shape index: {}]   ;;  %s398_s2 = inlined_call_operand.vmem [shape: f32[8,4], index: 2, kind: input, shape index: {}]   ;;  %s399_s4 = inlined_call_operand.vmem [shape: f32[8,1], index: 4, kind: input, shape index: {}]   ;;  %s400_s5 = inlined_call_operand.vmem [shape: f32[8,1], index: 5, kind: input, shape index: {}]   ;;  %s401_s6 = inlined_call_operand.vmem [shape: f32[8,384], index: 6, kind: output, shape index: {}]  }
   0x1   :  { %291 = vmatprep.subr.bf16.mxu1 %v312_v0  ;;  %v37_v1 = vld [vmem:[%s395_s1 + $0x8] sm:$0xf]  ;;  %v36_v2 = vld [vmem:[%s395_s1] sm:$0xff]  ;;  %293 = vmatprep.mubr.msk.bf16.mxu1 %vm313_vm1, %v312_v0  ;;  %vm44_vm2 = vcmask 31744  }
   0x2   :  { %v34_v3 = vld [vmem:[%s396_s3] sm:$0xff]  ;;  %v43_v4 = vpack.c.bf16 %v37_v1, %v37_v1  ;;  %v39_v5 = vcombine.high %v36_v2, %v36_v2  ;;  %v41_v6 = vpack.c.bf16 %v36_v2, %v36_v2  ;;  %90 = vmatprep.mubr.bf16.mxu0 %v314_v7  ;;  %v27_v9 = vld [vmem:[%s397_s0 + $0x8] sm:$0xf]  ;;  %306 = vset.pattern.permute.xlu1 %v314_v7 }
   0x3   :  { %v26_v8 = vld [vmem:[%s397_s0] sm:$0xff]  ;;  %v35_v10 = vpack.c.bf16 %v34_v3, %v34_v3  ;;  %v33_v12 = vpack.c.bf16 %v27_v9, %v27_v9  ;;  %307 = vset.pattern.permute.xlu0 %v314_v7 }
   0x4   :  { %v29_v11 = vcombine.high %v26_v8, %v26_v8  ;;  %v56_v13 = vsel %vm48_vm0, %v43_v4, 0  ;;  %v42_v14 = vpack.c.bf16 %v39_v5, %v39_v5  ;;  %v50_v15 = vsel %vm48_vm0, %v41_v6, 0  ;;  %v24_v20 = vld [vmem:[%s398_s2] sm:$0xff] }
   0x5   :  { %v31_v16 = vpack.c.bf16 %v26_v8, %v26_v8  ;;  %292 = vmatpush3.bf16.msra.mxu1 %v56_v13  ;;  %v149_v18 = vsel %vm48_vm0, %v33_v12, 0  ;;  %v25_v21 = vpack.c.bf16 %v24_v20, %v24_v20  ;;  %v249_v55 = vld [vmem:[%s399_s4] sm:$0xff] }
   0x6   :  { %v32_v17 = vpack.c.bf16 %v29_v11, %v29_v11  ;;  %281 = vmatprep.subr.msk.bf16.mxu0 %vm48_vm0, %v42_v14  ;;  %297 = vmatprep.subr.bf16.mxu1 %v312_v0  ;;  %v262_v58 = vld [vmem:[%s400_s5] sm:$0xff] }
   0x7   :  { %73 = vmatpush1.bf16.msra.mxu0 %v50_v15  ;;  %v143_v19 = vsel %vm48_vm0, %v31_v16, 0 }
   0x8   :  { %294 = vmatmul.mubr.msk.bf16.vlgmr.msra.gmra.mxu1 %vm44_vm2, %v35_v10  ;;  %284 = vmatprep.subr.msk.bf16.mxu0 %vm48_vm0, %v32_v17 }
   0x9   :  { %298 = vmatpush3.bf16.msra.mxu1 %v149_v18  ;;  %299 = vmatprep.mubr.msk.bf16.mxu1 %vm313_vm1, %v312_v0 }
   0xa   :  { %282 = vmatmul.mubr.msk.bf16.vlgmr.msra.gmra.mxu0 %vm44_vm2, %v35_v10 }
   0xb   :  { %166 = vmatpush1.bf16.msra.mxu0 %v143_v19  ;;  %183 = vmatprep.mubr.bf16.mxu0 %v314_v7 }
  0x10   :  { %300 = vmatmul.mubr.msk.bf16.vlgmr.msra.gmra.mxu1 %vm44_vm2, %v25_v21 }
  0x12   :  { %285 = vmatmul.mubr.msk.bf16.vlgmr.msra.gmra.mxu0 %vm44_vm2, %v25_v21 }
  0xc8   :  { %v133_v22 = vpop.f32.mrf.mxu1 }
  0xca   :  { %v92_v23 = vpop.f32.mrf.mxu0  ;;  %v295_v24 = vpop.f32.mrf.mxu1 }
  0xcc   :  { %v94_v25 = vpop.f32.mrf.mxu0  ;;  %v136_v26 = vpop.f32.mrf.mxu1 }
  0xce   :  { %v96_v27 = vpop.f32.mrf.mxu0  ;;  %v296_v28 = vpop.f32.mrf.mxu1 }
  0xd0   :  { %v97_v29 = vpop.f32.mrf.mxu0  ;;  %v226_v30 = vpop.f32.mrf.mxu1 }
  0xd1   :  { %v227_v39 = vadd.f32 %v226_v30, %v133_v22 }
  0xd2   :  { %v185_v31 = vpop.f32.mrf.mxu0  ;;  %v301_v32 = vpop.f32.mrf.mxu1 }
  0xd3   :  { %v186_v33 = vadd.f32 %v185_v31, %v92_v23  ;;  %v238_v46 = vmul.f32 %v227_v39, %v227_v39 }
  0xd4   :  { %v187_v34 = vpop.f32.mrf.mxu0  ;;  %v229_v35 = vpop.f32.mrf.mxu1 }
  0xd5   :  { %v188_v36 = vadd.f32 %v187_v34, %v94_v25  ;;  %v236_v40 = vmul.f32 %v186_v33, %v186_v33 }
  0xd6   :  { %v189_v37 = vpop.f32.mrf.mxu0  ;;  %v302_v38 = vpop.f32.mrf.mxu1 }
  0xd7   :  { %v237_v41 = vmul.f32 %v188_v36, %v188_v36  ;;  %v232_v42 = vadd.f32 %v188_v36, %v186_v33 }
  0xd8   :  { %v190_v43 = vpop.f32.mrf.mxu0 }
  0xd9   :  { %v233_v44 = vadd.f32 %v232_v42, %v227_v39  ;;  %v239_v45 = vadd.f32 %v237_v41, %v236_v40 }
  0xdb   :  { %234 = vadd.xlane.f32.xlu0 %v233_v44  ;;  %v240_v47 = vadd.f32 %v239_v45, %v238_v46 }
  0xdf   :  { %241 = vadd.xlane.f32.xlu0 %v240_v47 }
 0x164   :  { %v235_v48 = vpop.xlane.xlu0 %234 }
 0x165   :  { %v243_v49 = vmul.f32 0.0034722222, %v235_v48 }
 0x167   :  { %v245_v51 = vmul.f32 %v243_v49, %v243_v49  ;;  %v251_v60 = vsub.f32 %v186_v33, %v243_v49  ;;  %v252_v61 = vsub.f32 %v188_v36, %v243_v49  ;;  %v253_v62 = vsub.f32 %v227_v39, %v243_v49 }
 0x168   :  { %v242_v50 = vpop.xlane.xlu0 %241 }
 0x169   :  { %v244_v52 = vmul.f32 0.0034722222, %v242_v50 }
 0x16b   :  { %v246_v53 = vsub.f32 %v244_v52, %v245_v51 }
 0x16d   :  { %v247_v54 = vadd.f32 1e-05, %v246_v53 }
 0x16f   :  { %310 = vrsqrt.f32 %v247_v54 }
 0x17c   :  { %v311_v56 = vpop.eup %310 }
 0x17d   :  { %v250_v57 = vmul.f32 %v311_v56, %v249_v55 }
 0x17f   :  { %256 = vperm.xlu1 %306, %v250_v57  }
 0x183   :  { %265 = vperm.xlu1 %306, %v262_v58  }
 0x1fa   :  { %v257_v59 = vpop.permute.xlu1 %256 }
 0x1fb   :  { %v259_v63 = vmul.f32 %v257_v59, %v251_v60  ;;  %v260_v0 = vmul.f32 %v257_v59, %v252_v61  ;;  %v261_v1 = vmul.f32 %v257_v59, %v253_v62 }
 0x1fe   :  { %v266_v2 = vpop.permute.xlu1 %265 }
 0x1ff   :  { %v268_v3 = vadd.f32 %v266_v2, %v259_v63  ;;  %v269_v4 = vadd.f32 %v266_v2, %v260_v0  ;;  %v270_v5 = vadd.f32 %v266_v2, %v261_v1 }
 0x201   :  { %v271_v6 = vmax.f32 %v268_v3, 0.0  ;;  %v272_v7 = vmax.f32 %v269_v4, 0.0  ;;  %v273_v8 = vmax.f32 %v270_v5, 0.0 }
 0x203   :  { %274 = vst [vmem:[%s401_s6] sm:$0xff] %v271_v6  ;;  %275 = vst [vmem:[%s401_s6 + $0x8] sm:$0xff] %v272_v7 }
 0x204   :  { %276 = vst [vmem:[%s401_s6 + $0x10] sm:$0xff] %v273_v8 }

// kernel: reverse.3
= control target key start
LH: loop header
LB: loop body
LE: loop exit
PB: predicated region body
PF: predicated region fallthrough
CT: control target
= control target key end

     0   :  { %v82_v8 = vld [vmem:[#allocation1 + $0x38] sm:$0xf]  ;;  %v92_v9 = vld [vmem:[#allocation1 + $0x30] sm:$0xf]  ;;  %v102_v10 = vld [vmem:[#allocation1 + $0x28] sm:$0xf]  ;;  %v159_v12 = vlaneseq  ;;  %s501_s0 = inlined_call_operand.vmem [shape: f32[4,2,8,3], index: 0, kind: input, shape index: {}]   ;;  %s502_s1 = inlined_call_operand.vmem [shape: f32[4,2,8,3], index: 1, kind: output, shape index: {}]  }
   0x1   :  { %v19_v0 = vld [vmem:[%s501_s0] sm:$0xf]  ;;  %v21_v1 = vld [vmem:[%s501_s0 + $0x4] sm:$0xf]  ;;  %v23_v2 = vld [vmem:[%s501_s0 + $0x8] sm:$0xf] }
   0x2   :  { %20 = vst [vmem:[#allocation1 + $0x4] sm:$0xf] %v19_v0  ;;  %22 = vst [vmem:[#allocation1 + $0xc] sm:$0xf] %v21_v1  ;;  %v25_v3 = vld [vmem:[%s501_s0 + $0xc] sm:$0xf] }
   0x3   :  { %24 = vst [vmem:[#allocation1 + $0x14] sm:$0xf] %v23_v2  ;;  %v27_v4 = vld [vmem:[%s501_s0 + $0x10] sm:$0xf]  ;;  %v29_v5 = vld [vmem:[%s501_s0 + $0x14] sm:$0xf] }
   0x4   :  { %26 = vst [vmem:[#allocation1 + $0x1c] sm:$0xf] %v25_v3  ;;  %28 = vst [vmem:[#allocation1 + $0x24] sm:$0xf] %v27_v4  ;;  %v31_v6 = vld [vmem:[%s501_s0 + $0x18] sm:$0xf] }
   0x5   :  { %30 = vst [vmem:[#allocation1 + $0x2c] sm:$0xf] %v29_v5  ;;  %v33_v7 = vld [vmem:[%s501_s0 + $0x1c] sm:$0xf]  ;;  %32 = vst [vmem:[#allocation1 + $0x34] sm:$0xf] %v31_v6 }
   0x6   :  { %34 = vst [vmem:[#allocation1 + $0x3c] sm:$0xf] %v33_v7  ;;  %84 = vst [vmem:[#allocation0 + $0x70] sm:$0xf] %v82_v8  ;;  %v112_v11 = vld [vmem:[#allocation1 + $0x20] sm:$0xf] }
   0x7   :  { %94 = vst [vmem:[#allocation0 + $0x60] sm:$0xf] %v92_v9  ;;  %104 = vst [vmem:[#allocation0 + $0x50] sm:$0xf] %v102_v10  ;;  %v122_v13 = vld [vmem:[#allocation1 + $0x18] sm:$0xf] }
   0x8   :  { %114 = vst [vmem:[#allocation0 + $0x40] sm:$0xf] %v112_v11  ;;  %v132_v14 = vld [vmem:[#allocation1 + $0x10] sm:$0xf]  ;;  %v142_v15 = vld [vmem:[#allocation1 + $0x8] sm:$0xf] }
   0x9   :  { %124 = vst [vmem:[#allocation0 + $0x30] sm:$0xf] %v122_v13  ;;  %134 = vst [vmem:[#allocation0 + $0x20] sm:$0xf] %v132_v14  ;;  %v149_v16 = vld [vmem:[#allocation1] sm:$0xf] }
   0xa   :  { %144 = vst [vmem:[#allocation0 + $0x10] sm:$0xf] %v142_v15  ;;  %150 = vst [vmem:[#allocation0] sm:$0xf] %v149_v16  ;;  %v470_v17 = vshrl.u32 %v159_v12, 7 }
   0xb   :  { %v127_v18 = vld [vmem:[#allocation1 + $0x14] sm:$0xf]  ;;  %v137_v19 = vld [vmem:[#allocation1 + $0xc] sm:$0xf]  ;;  %v146_v20 = vld [vmem:[#allocation1 + $0x4] sm:$0xf] }
   0xc   :  { %v97_v21 = vld [vmem:[#allocation1 + $0x2c] sm:$0xf]  ;;  %v107_v22 = vld [vmem:[#allocation1 + $0x24] sm:$0xf]  ;;  %v117_v23 = vld [vmem:[#allocation1 + $0x1c] sm:$0xf] }
   0xd   :  { %129 = vst [vmem:[#allocation0 + $0x28] sm:$0xf] %v127_v18  ;;  %139 = vst [vmem:[#allocation0 + $0x18] sm:$0xf] %v137_v19  ;;  %v77_v24 = vld [vmem:[#allocation1 + $0x3c] sm:$0xf] }
   0xe   :  { %148 = vst [vmem:[#allocation0 + $0x8] sm:$0xf] %v146_v20  ;;  %v87_v25 = vld [vmem:[#allocation1 + $0x34] sm:$0xf]  ;;  %99 = vst [vmem:[#allocation0 + $0x58] sm:$0xf] %v97_v21 }
   0xf   :  { %109 = vst [vmem:[#allocation0 + $0x48] sm:$0xf] %v107_v22  ;;  %119 = vst [vmem:[#allocation0 + $0x38] sm:$0xf] %v117_v23  ;;  %v250_v26 = vld [vmem:[#allocation0 + $0x77] ss:$-1 sm:$0xff] }
  0x10   :  { %79 = vst [vmem:[#allocation0 + $0x78] sm:$0xf] %v77_v24  ;;  %89 = vst [vmem:[#allocation0 + $0x68] sm:$0xf] %v87_v25  ;;  %v208_v27 = vld [vmem:[#allocation0 + $0x47] ss:$-1 sm:$0xff] }
  0x11   :  { %v222_v28 = vld [vmem:[#allocation0 + $0x57] ss:$-1 sm:$0xff]  ;;  %v236_v29 = vld [vmem:[#allocation0 + $0x67] ss:$-1 sm:$0xff]  ;;  %v209_v37 = vrot.slane %v208_v27, 5  ;;  %v251_v41 = vrot.slane %v250_v26, 5 }
  0x12   :  { %v166_v30 = vld [vmem:[#allocation0 + $0x17] ss:$-1 sm:$0xff]  ;;  %v180_v31 = vld [vmem:[#allocation0 + $0x27] ss:$-1 sm:$0xff]  ;;  %v223_v39 = vrot.slane %v222_v28, 5  ;;  %v237_v40 = vrot.slane %v236_v29, 5 }
  0x13   :  { %v194_v32 = vld [vmem:[#allocation0 + $0x37] ss:$-1 sm:$0xff]  ;;  %v152_v33 = vld [vmem:[#allocation0 + $0x7] ss:$-1 sm:$0xff]  ;;  %v167_v34 = vrot.slane %v166_v30, 5  ;;  %v181_v35 = vrot.slane %v180_v31, 5 }
  0x14   :  { %v195_v36 = vrot.slane %v194_v32, 5  ;;  %v153_v38 = vrot.slane %v152_v33, 5  ;;  %vm161_vm0 = vcmp.lt.s32.totalorder %v470_v17, 3  ;;  %210 = vst [vmem:[#allocation2 + $0x20] sm:$0xff] %v209_v37  ;;  %v171_v43 = vld [vmem:[#allocation0 + $0x1f] ss:$-1 sm:$0xff] }
  0x15   :  { %168 = vst [vmem:[#allocation2 + $0x8] sm:$0xff] %v167_v34  ;;  %182 = vst [vmem:[#allocation2 + $0x10] sm:$0xff] %v181_v35  ;;  %v157_v42 = vld [vmem:[#allocation0 + $0xf] ss:$-1 sm:$0xff]  ;;  %v172_v46 = vrot.slane %v171_v43, 5 }
  0x16   :  { %196 = vst [vmem:[#allocation2 + $0x18] sm:$0xff] %v195_v36  ;;  %154 = vst [vmem:[#allocation2] sm:$0xff] %v153_v38  ;;  %v185_v44 = vld [vmem:[#allocation0 + $0x2f] ss:$-1 sm:$0xff]  ;;  %v158_v45 = vrot.slane %v157_v42, 5 }
  0x17   :  { %224 = vst [vmem:[#allocation2 + $0x28] sm:$0xff] %v223_v39  ;;  %238 = vst [vmem:[#allocation2 + $0x30] sm:$0xff] %v237_v40  ;;  %v186_v47 = vrot.slane %v185_v44, 5  ;;  %v199_v48 = vld [vmem:[#allocation0 + $0x3f] ss:$-1 sm:$0xff] }
  0x18   :  { %252 = vst [vmem:[#allocation2 + $0x38] sm:$0xff] %v251_v41  ;;  %v200_v49 = vrot.slane %v199_v48, 5  ;;  %v213_v50 = vld [vmem:[#allocation0 + $0x4f] ss:$-1 sm:$0xff]  ;;  %v227_v51 = vld [vmem:[#allocation0 + $0x5f] ss:$-1 sm:$0xff] }
  0x19   :  { %162 = vst.msk [vmem:[#allocation2] sm:$0xff] %vm161_vm0, %v158_v45  ;;  %176 = vst.msk [vmem:[#allocation2 + $0x8] sm:$0xff] %vm161_vm0, %v172_v46  ;;  %v214_v52 = vrot.slane %v213_v50, 5  ;;  %v228_v53 = vrot.slane %v227_v51, 5  ;;  %v241_v54 = vld [vmem:[#allocation0 + $0x6f] ss:$-1 sm:$0xff] }
  0x1a   :  { %190 = vst.msk [vmem:[#allocation2 + $0x10] sm:$0xff] %vm161_vm0, %v186_v47  ;;  %v255_v55 = vld [vmem:[#allocation0 + $0x7f] ss:$-1 sm:$0xff]  ;;  %204 = vst.msk [vmem:[#allocation2 + $0x18] sm:$0xff] %vm161_vm0, %v200_v49  ;;  %v242_v56 = vrot.slane %v241_v54, 5 }
  0x1b   :  { %v256_v57 = vrot.slane %v255_v55, 5  ;;  %218 = vst.msk [vmem:[#allocation2 + $0x20] sm:$0xff] %vm161_vm0, %v214_v52  ;;  %232 = vst.msk [vmem:[#allocation2 + $0x28] sm:$0xff] %vm161_vm0, %v228_v53 }
  0x1c   :  { %246 = vst.msk [vmem:[#allocation2 + $0x30] sm:$0xff] %vm161_vm0, %v242_v56 }
  0x1d   :  { %260 = vst.msk [vmem:[#allocation2 + $0x38] sm:$0xff] %vm161_vm0, %v256_v57 }
  0x20   :  { %v265_v58 = vld [vmem:[#allocation2] sm:$0xf]  ;;  %v270_v59 = vld [vmem:[#allocation2 + $0x8] sm:$0xf] }
  0x21   :  { %v276_v60 = vld [vmem:[#allocation2 + $0x10] sm:$0xf]  ;;  %268 = vst [vmem:[#allocation3] sm:$0xf] %v265_v58  ;;  %274 = vst [vmem:[#allocation3 + $0x4] sm:$0xf] %v270_v59 }
  0x22   :  { %281 = vst [vmem:[#allocation3 + $0x8] sm:$0xf] %v276_v60  ;;  %v283_v61 = vld [vmem:[#allocation2 + $0x18] sm:$0xf]  ;;  %v290_v62 = vld [vmem:[#allocation2 + $0x20] sm:$0xf] }
  0x23   :  { %288 = vst [vmem:[#allocation3 + $0xc] sm:$0xf] %v283_v61  ;;  %v297_v63 = vld [vmem:[#allocation2 + $0x28] sm:$0xf]  ;;  %295 = vst [vmem:[#allocation3 + $0x10] sm:$0xf] %v290_v62 }
  0x24   :  { %302 = vst [vmem:[#allocation3 + $0x14] sm:$0xf] %v297_v63  ;;  %v304_v0 = vld [vmem:[#allocation2 + $0x30] sm:$0xf]  ;;  %v311_v1 = vld [vmem:[#allocation2 + $0x38] sm:$0xf] }
  0x25   :  { %309 = vst [vmem:[#allocation3 + $0x18] sm:$0xf] %v304_v0  ;;  %316 = vst [vmem:[#allocation3 + $0x1c] sm:$0xf] %v311_v1 }
  0x28   :  { %v333_v2 = vld [vmem:[#allocation3] sm:$0xff]  }
  0x29   :  { %334 = vst [vmem:[%s502_s1] sm:$0xff] %v333_v2  }
  0x2a   :  { %v337_v3 = vld [vmem:[#allocation3 + $0x8] sm:$0xff]  }
  0x2b   :  { %338 = vst [vmem:[%s502_s1 + $0x8] sm:$0xff] %v337_v3   ;;  %v341_v4 = vld [vmem:[#allocation3 + $0x10] sm:$0xff]  }
  0x2c   :  { %342 = vst [vmem:[%s502_s1 + $0x10] sm:$0xff] %v341_v4   ;;  %v345_v5 = vld [vmem:[#allocation3 + $0x18] sm:$0xff]  }
  0x2d   :  { %346 = vst [vmem:[%s502_s1 + $0x18] sm:$0xff] %v345_v5  }

// kernel: tile.9
= control target key start
LH: loop header
LB: loop body
LE: loop exit
PB: predicated region body
PF: predicated region fallthrough
CT: control target
= control target key end

     0   :  { %vm644_vm0 = vcmask 1041409   ;;  %vm648_vm1 = vcmask 1042434   ;;  %vm652_vm2 = vcmask 1043459   ;;  %vm656_vm3 = vcmask 1044484   ;;  %s2105_s15 = smov 112   ;;  %s2106_s18 = smov 120   ;;  %s2768_s0 = inlined_call_operand.vmem [shape: f32[4,2,2,8,2,8], index: 0, kind: input, shape index: {}]   ;;  %s2769_s1 = inlined_call_operand.vmem [shape: f32[4,512], index: 1, kind: output, shape index: {}]  }
   0x1   :  { %v1976_v0 = vld [vmem:[%s2768_s0 + $0xde] sm:$0x3]  ;;  %v1984_v1 = vld [vmem:[%s2768_s0 + $0xce] sm:$0x3]  ;;  %v1961_v16 = vld [vmem:[%s2768_s0 + $0xfc] sm:$0x3] }
   0x2   :  { %v2008_v2 = vld [vmem:[%s2768_s0 + $0x9e] sm:$0x3]  ;;  %89 = vst [vmem:[#allocation1 + $0x378] sm:$0x3] %v1976_v0  ;;  %129 = vst [vmem:[#allocation1 + $0x338] sm:$0x3] %v1984_v1 }
   0x3   :  { %249 = vst [vmem:[#allocation1 + $0x278] sm:$0x3] %v2008_v2  ;;  %v2016_v3 = vld [vmem:[%s2768_s0 + $0x8e] sm:$0x3]  ;;  %v2040_v4 = vld [vmem:[%s2768_s0 + $0x5e] sm:$0x3] }
   0x4   :  { %v2048_v5 = vld [vmem:[%s2768_s0 + $0x4e] sm:$0x3]  ;;  %289 = vst [vmem:[#allocation1 + $0x238] sm:$0x3] %v2016_v3  ;;  %409 = vst [vmem:[#allocation1 + $0x178] sm:$0x3] %v2040_v4 }
   0x5   :  { %449 = vst [vmem:[#allocation1 + $0x138] sm:$0x3] %v2048_v5  ;;  %v2072_v6 = vld [vmem:[%s2768_s0 + $0x1e] sm:$0x3]  ;;  %v2080_v7 = vld [vmem:[%s2768_s0 + $0xe] sm:$0x3] }
   0x6   :  { %569 = vst [vmem:[#allocation1 + $0x78] sm:$0x3] %v2072_v6  ;;  %609 = vst [vmem:[#allocation1 + $0x38] sm:$0x3] %v2080_v7  ;;  %v1960_v8 = vld [vmem:[%s2768_s0 + $0xfe] sm:$0x3] }
   0x7   :  { %v1968_v9 = vld [vmem:[%s2768_s0 + $0xee] sm:$0x3]  ;;  %9 = vst [vmem:[#allocation1 + $0x3f8] sm:$0x3] %v1960_v8  ;;  %v1992_v10 = vld [vmem:[%s2768_s0 + $0xbe] sm:$0x3] }
   0x8   :  { %49 = vst [vmem:[#allocation1 + $0x3b8] sm:$0x3] %v1968_v9  ;;  %v2000_v11 = vld [vmem:[%s2768_s0 + $0xae] sm:$0x3]  ;;  %v2024_v12 = vld [vmem:[%s2768_s0 + $0x7e] sm:$0x3] }
   0x9   :  { %169 = vst [vmem:[#allocation1 + $0x2f8] sm:$0x3] %v1992_v10  ;;  %209 = vst [vmem:[#allocation1 + $0x2b8] sm:$0x3] %v2000_v11  ;;  %v2032_v13 = vld [vmem:[%s2768_s0 + $0x6e] sm:$0x3] }
   0xa   :  { %329 = vst [vmem:[#allocation1 + $0x1f8] sm:$0x3] %v2024_v12  ;;  %v2056_v14 = vld [vmem:[%s2768_s0 + $0x3e] sm:$0x3]  ;;  %v2064_v15 = vld [vmem:[%s2768_s0 + $0x2e] sm:$0x3] }
   0xb   :  { %369 = vst [vmem:[#allocation1 + $0x1b8] sm:$0x3] %v2032_v13  ;;  %489 = vst [vmem:[#allocation1 + $0xf8] sm:$0x3] %v2056_v14  ;;  %v1969_v17 = vld [vmem:[%s2768_s0 + $0xec] sm:$0x3] }
   0xc   :  { %529 = vst [vmem:[#allocation1 + $0xb8] sm:$0x3] %v2064_v15  ;;  %v1993_v18 = vld [vmem:[%s2768_s0 + $0xbc] sm:$0x3]  ;;  %vm660_vm4 = vcmask 1045509   ;;  %vm664_vm5 = vcmask 1046534  }
   0xd   :  { %vm668_vm6 = vcmask 1047559   ;;  %14 = vst [vmem:[#allocation1 + $0x3f0] sm:$0x3] %v1961_v16  ;;  %54 = vst [vmem:[#allocation1 + $0x3b0] sm:$0x3] %v1969_v17  ;;  %s2107_s26 = smov 104  }
   0xe   :  { %174 = vst [vmem:[#allocation1 + $0x2f0] sm:$0x3] %v1993_v18  ;;  %v785_v19 = vld [vmem:[#allocation1 + $0x137] sm:$0x2]   ;;  %v710_v24 = vld [vmem:[#allocation1 + $0x39] sm:$0x1]  }
   0xf   :  { %v789_v20 = vld [vmem:[#allocation1 + $0x236] sm:$0x4]   ;;  %v712_v27 = vld [vmem:[#allocation1 + $0x138] sm:$0x2]   ;;  %v2001_v6 = vld [vmem:[%s2768_s0 + $0xac] sm:$0x3] }
  0x10   :  { %v793_v21 = vld [vmem:[#allocation1 + $0x335] sm:$0x8]   ;;  %v716_v28 = vld [vmem:[#allocation1 + $0x237] sm:$0x4]   ;;  %v714_v33 = vsel %vm644_vm0, %v712_v27, %v710_v24  ;;  %214 = vst [vmem:[#allocation1 + $0x2b0] sm:$0x3] %v2001_v6 }
  0x11   :  { %v783_v22 = vld [vmem:[#allocation1 + $0x38] sm:$0x1]   ;;  %v720_v29 = vld [vmem:[#allocation1 + $0x336] sm:$0x8]   ;;  %v718_v37 = vsel %vm648_vm1, %v716_v28, %v714_v33  ;;  %v2025_v9 = vld [vmem:[%s2768_s0 + $0x7c] sm:$0x3] }
  0x12   :  { %v797_v23 = vld [vmem:[#allocation1 + $0x74] sm:$0x10]   ;;  %v787_v25 = vsel %vm644_vm0, %v785_v19, %v783_v22  ;;  %v724_v34 = vld [vmem:[#allocation1 + $0x75] sm:$0x10]   ;;  %v722_v42 = vsel %vm652_vm2, %v720_v29, %v718_v37  ;;  %v2033_v10 = vld [vmem:[%s2768_s0 + $0x6c] sm:$0x3] }
  0x13   :  { %v805_v26 = vld [vmem:[#allocation1 + $0x272] sm:$0x40]   ;;  %v791_v30 = vsel %vm648_vm1, %v789_v20, %v787_v25  ;;  %v728_v35 = vld [vmem:[#allocation1 + $0x174] sm:$0x20]   ;;  %v726_v47 = vsel %vm656_vm3, %v724_v34, %v722_v42  ;;  %v2057_v11 = vld [vmem:[%s2768_s0 + $0x3c] sm:$0x3] }
  0x14   :  { %v801_v31 = vld [vmem:[#allocation1 + $0x173] sm:$0x20]   ;;  %v795_v36 = vsel %vm652_vm2, %v793_v21, %v791_v30  ;;  %v732_v38 = vld [vmem:[#allocation1 + $0x273] sm:$0x40]   ;;  %v730_v53 = vsel %vm660_vm4, %v728_v35, %v726_v47  ;;  %334 = vst [vmem:[#allocation1 + $0x1f0] sm:$0x3] %v2025_v9 }
  0x15   :  { %v809_v32 = vld [vmem:[#allocation1 + $0x371] sm:$0x80]   ;;  %v736_v39 = vld [vmem:[#allocation1 + $0x372] sm:$0x80]   ;;  %v799_v41 = vsel %vm656_vm3, %v797_v23, %v795_v36  ;;  %v734_v59 = vsel %vm664_vm5, %v732_v38, %v730_v53  ;;  %374 = vst [vmem:[#allocation1 + $0x1b0] sm:$0x3] %v2033_v10 }
  0x16   :  { %v825_v40 = vld [vmem:[#allocation1 + $0x2b6] sm:$0x4]   ;;  %v803_v46 = vsel %vm660_vm4, %v801_v31, %v799_v41  ;;  %v746_v55 = vld [vmem:[#allocation1 + $0xb9] sm:$0x1]   ;;  %v738_v1 = vsel %vm668_vm6, %v736_v39, %v734_v59  ;;  %494 = vst [vmem:[#allocation1 + $0xf0] sm:$0x3] %v2057_v11 }
  0x17   :  { %v819_v43 = vld [vmem:[#allocation1 + $0xb8] sm:$0x1]   ;;  %v807_v52 = vsel %vm664_vm5, %v805_v26, %v803_v46  ;;  %v748_v56 = vld [vmem:[#allocation1 + $0x1b8] sm:$0x2]   ;;  %739 = vrot.lane.b32.xlu0 %v738_v1, %s2106_s18  ;;  %v2065_v15 = vld [vmem:[%s2768_s0 + $0x2c] sm:$0x3] }
  0x18   :  { %v821_v44 = vld [vmem:[#allocation1 + $0x1b7] sm:$0x2]   ;;  %v752_v57 = vld [vmem:[#allocation1 + $0x2b7] sm:$0x4]   ;;  %v811_v58 = vsel %vm668_vm6, %v809_v32, %v807_v52  ;;  %v750_v62 = vsel %vm644_vm0, %v748_v56, %v746_v55  ;;  %534 = vst [vmem:[#allocation1 + $0xb0] sm:$0x3] %v2065_v15 }
  0x19   :  { %v829_v45 = vld [vmem:[#allocation1 + $0x3b5] sm:$0x8]   ;;  %v823_v48 = vsel %vm644_vm0, %v821_v44, %v819_v43  ;;  %v756_v63 = vld [vmem:[#allocation1 + $0x3b6] sm:$0x8]   ;;  %812 = vrot.lane.b32.xlu1 %v811_v58, %s2105_s15  ;;  %v754_v3 = vsel %vm648_vm1, %v752_v57, %v750_v62  ;;  %v1977_v18 = vld [vmem:[%s2768_s0 + $0xdc] sm:$0x3] }
  0x1a   :  { %v833_v49 = vld [vmem:[#allocation1 + $0xf4] sm:$0x10]   ;;  %v827_v54 = vsel %vm648_vm1, %v825_v40, %v823_v48  ;;  %v760_v0 = vld [vmem:[#allocation1 + $0xf5] sm:$0x10]   ;;  %v758_v8 = vsel %vm652_vm2, %v756_v63, %v754_v3  ;;  %v1985_v19 = vld [vmem:[%s2768_s0 + $0xcc] sm:$0x3] }
  0x1b   :  { %v837_v50 = vld [vmem:[#allocation1 + $0x1f3] sm:$0x20]   ;;  %v831_v60 = vsel %vm652_vm2, %v829_v45, %v827_v54  ;;  %v764_v4 = vld [vmem:[#allocation1 + $0x1f4] sm:$0x20]   ;;  %v762_v13 = vsel %vm656_vm3, %v760_v0, %v758_v8  ;;  %94 = vst [vmem:[#allocation1 + $0x370] sm:$0x3] %v1977_v18 }
  0x1c   :  { %v841_v51 = vld [vmem:[#allocation1 + $0x2f2] sm:$0x40]   ;;  %v835_v2 = vsel %vm656_vm3, %v833_v49, %v831_v60  ;;  %v768_v5 = vld [vmem:[#allocation1 + $0x2f3] sm:$0x40]   ;;  %v766_v17 = vsel %vm660_vm4, %v764_v4, %v762_v13  ;;  %134 = vst [vmem:[#allocation1 + $0x330] sm:$0x3] %v1985_v19 }
  0x1d   :  { %v845_v61 = vld [vmem:[#allocation1 + $0x3f1] sm:$0x80]   ;;  %v839_v7 = vsel %vm660_vm4, %v837_v50, %v835_v2  ;;  %v772_v14 = vld [vmem:[#allocation1 + $0x3f2] sm:$0x80]   ;;  %v770_v20 = vsel %vm664_vm5, %v768_v5, %v766_v17  ;;  %v2009_v21 = vld [vmem:[%s2768_s0 + $0x9c] sm:$0x3] }
  0x1e   :  { %v843_v12 = vsel %vm664_vm5, %v841_v51, %v839_v7  ;;  %v2017_v22 = vld [vmem:[%s2768_s0 + $0x8c] sm:$0x3]  ;;  %v2041_v23 = vld [vmem:[%s2768_s0 + $0x5c] sm:$0x3]  ;;  %v774_v24 = vsel %vm668_vm6, %v772_v14, %v770_v20  ;;  %254 = vst [vmem:[#allocation1 + $0x270] sm:$0x3] %v2009_v21 }
  0x1f   :  { %v847_v16 = vsel %vm668_vm6, %v845_v61, %v843_v12  ;;  %294 = vst [vmem:[#allocation1 + $0x230] sm:$0x3] %v2017_v22  ;;  %414 = vst [vmem:[#allocation1 + $0x170] sm:$0x3] %v2041_v23  ;;  %v2049_v25 = vld [vmem:[%s2768_s0 + $0x4c] sm:$0x3]  ;;  %775 = vrot.lane.b32.xlu0 %v774_v24, %s2106_s18 }
  0x20   :  { %848 = vrot.lane.b32.xlu1 %v847_v16, %s2105_s15  ;;  %v2073_v26 = vld [vmem:[%s2768_s0 + $0x1c] sm:$0x3]  ;;  %v2081_v27 = vld [vmem:[%s2768_s0 + $0xc] sm:$0x3]  ;;  %454 = vst [vmem:[#allocation1 + $0x130] sm:$0x3] %v2049_v25 }
  0x21   :  { %574 = vst [vmem:[#allocation1 + $0x70] sm:$0x3] %v2073_v26  ;;  %614 = vst [vmem:[#allocation1 + $0x30] sm:$0x3] %v2081_v27  ;;  %v1962_v28 = vld [vmem:[%s2768_s0 + $0xfa] sm:$0x3] }
  0x22   :  { %v1970_v29 = vld [vmem:[%s2768_s0 + $0xea] sm:$0x3]  ;;  %v902_v30 = vld [vmem:[#allocation1 + $0x3ae] sm:$0x8]   ;;  %v975_v31 = vld [vmem:[#allocation1 + $0x3ad] sm:$0x8]  }
  0x23   :  { %19 = vst [vmem:[#allocation1 + $0x3e8] sm:$0x3] %v1962_v28  ;;  %59 = vst [vmem:[#allocation1 + $0x3a8] sm:$0x3] %v1970_v29  ;;  %v1994_v32 = vld [vmem:[%s2768_s0 + $0xba] sm:$0x3] }
  0x24   :  { %v894_v33 = vld [vmem:[#allocation1 + $0x1b0] sm:$0x2]   ;;  %v971_v35 = vld [vmem:[#allocation1 + $0x2ae] sm:$0x4]   ;;  %179 = vst [vmem:[#allocation1 + $0x2e8] sm:$0x3] %v1994_v32 }
  0x25   :  { %v898_v34 = vld [vmem:[#allocation1 + $0x2af] sm:$0x4]   ;;  %v965_v37 = vld [vmem:[#allocation1 + $0xb0] sm:$0x1]   ;;  %v2002_v18 = vld [vmem:[%s2768_s0 + $0xaa] sm:$0x3] }
  0x26   :  { %v892_v36 = vld [vmem:[#allocation1 + $0xb1] sm:$0x1]   ;;  %v967_v38 = vld [vmem:[#allocation1 + $0x1af] sm:$0x2]   ;;  %v2026_v19 = vld [vmem:[%s2768_s0 + $0x7a] sm:$0x3] }
  0x27   :  { %v896_v39 = vsel %vm644_vm0, %v894_v33, %v892_v36  ;;  %v906_v40 = vld [vmem:[#allocation1 + $0xed] sm:$0x10]   ;;  %v969_v42 = vsel %vm644_vm0, %v967_v38, %v965_v37  ;;  %v979_v43 = vld [vmem:[#allocation1 + $0xec] sm:$0x10]   ;;  %v2034_v20 = vld [vmem:[%s2768_s0 + $0x6a] sm:$0x3] }
  0x28   :  { %v914_v41 = vld [vmem:[#allocation1 + $0x2eb] sm:$0x40]   ;;  %v987_v44 = vld [vmem:[#allocation1 + $0x2ea] sm:$0x40]   ;;  %v900_v45 = vsel %vm648_vm1, %v898_v34, %v896_v39  ;;  %v973_v50 = vsel %vm648_vm1, %v971_v35, %v969_v42  ;;  %219 = vst [vmem:[#allocation1 + $0x2a8] sm:$0x3] %v2002_v18 }
  0x29   :  { %v910_v46 = vld [vmem:[#allocation1 + $0x1ec] sm:$0x20]   ;;  %v904_v51 = vsel %vm652_vm2, %v902_v30, %v900_v45  ;;  %v977_v56 = vsel %vm652_vm2, %v975_v31, %v973_v50  ;;  %v983_v60 = vld [vmem:[#allocation1 + $0x1eb] sm:$0x20]   ;;  %339 = vst [vmem:[#allocation1 + $0x1e8] sm:$0x3] %v2026_v19 }
  0x2a   :  { %v918_v47 = vld [vmem:[#allocation1 + $0x3ea] sm:$0x80]   ;;  %v908_v57 = vsel %vm656_vm3, %v906_v40, %v904_v51  ;;  %v981_v59 = vsel %vm656_vm3, %v979_v43, %v977_v56  ;;  %v991_v61 = vld [vmem:[#allocation1 + $0x3e9] sm:$0x80]   ;;  %379 = vst [vmem:[#allocation1 + $0x1a8] sm:$0x3] %v2034_v20 }
  0x2b   :  { %v862_v48 = vld [vmem:[#allocation1 + $0x22f] sm:$0x4]   ;;  %v929_v62 = vld [vmem:[#allocation1 + $0x30] sm:$0x1]   ;;  %v912_v0 = vsel %vm660_vm4, %v910_v46, %v908_v57  ;;  %v985_v3 = vsel %vm660_vm4, %v983_v60, %v981_v59  ;;  %v2058_v23 = vld [vmem:[%s2768_s0 + $0x3a] sm:$0x3] }
  0x2c   :  { %v866_v49 = vld [vmem:[#allocation1 + $0x32e] sm:$0x8]   ;;  %v931_v63 = vld [vmem:[#allocation1 + $0x12f] sm:$0x2]   ;;  %v916_v8 = vsel %vm664_vm5, %v914_v41, %v912_v0  ;;  %v989_v11 = vsel %vm664_vm5, %v987_v44, %v985_v3  ;;  %v2066_v24 = vld [vmem:[%s2768_s0 + $0x2a] sm:$0x3] }
  0x2d   :  { %v856_v52 = vld [vmem:[#allocation1 + $0x31] sm:$0x1]   ;;  %v933_v4 = vsel %vm644_vm0, %v931_v63, %v929_v62  ;;  %v935_v5 = vld [vmem:[#allocation1 + $0x22e] sm:$0x4]   ;;  %v920_v15 = vsel %vm668_vm6, %v918_v47, %v916_v8  ;;  %v993_v26 = vsel %vm668_vm6, %v991_v61, %v989_v11  ;;  %499 = vst [vmem:[#allocation1 + $0xe8] sm:$0x3] %v2058_v23 }
  0x2e   :  { %v858_v53 = vld [vmem:[#allocation1 + $0x130] sm:$0x2]   ;;  %v939_v6 = vld [vmem:[#allocation1 + $0x32d] sm:$0x8]   ;;  %v937_v12 = vsel %vm648_vm1, %v935_v5, %v933_v4  ;;  %921 = vrot.lane.b32.xlu1 %v920_v15, %s2107_s26  ;;  %539 = vst [vmem:[#allocation1 + $0xa8] sm:$0x3] %v2066_v24 }
  0x2f   :  { %v870_v54 = vld [vmem:[#allocation1 + $0x6d] sm:$0x10]   ;;  %v860_v58 = vsel %vm644_vm0, %v858_v53, %v856_v52  ;;  %v943_v7 = vld [vmem:[#allocation1 + $0x6c] sm:$0x10]   ;;  %v941_v17 = vsel %vm652_vm2, %v939_v6, %v937_v12  ;;  %v1978_v29 = vld [vmem:[%s2768_s0 + $0xda] sm:$0x3] }
  0x30   :  { %v874_v55 = vld [vmem:[#allocation1 + $0x16c] sm:$0x20]   ;;  %v864_v1 = vsel %vm648_vm1, %v862_v48, %v860_v58  ;;  %v947_v13 = vld [vmem:[#allocation1 + $0x16b] sm:$0x20]   ;;  %v945_v22 = vsel %vm656_vm3, %v943_v7, %v941_v17  ;;  %99 = vst [vmem:[#allocation1 + $0x368] sm:$0x3] %v1978_v29 }
  0x31   :  { %v882_v2 = vld [vmem:[#allocation1 + $0x36a] sm:$0x80]   ;;  %v868_v9 = vsel %vm652_vm2, %v866_v49, %v864_v1  ;;  %v951_v14 = vld [vmem:[#allocation1 + $0x26a] sm:$0x40]   ;;  %v949_v27 = vsel %vm660_vm4, %v947_v13, %v945_v22  ;;  %v1986_v32 = vld [vmem:[%s2768_s0 + $0xca] sm:$0x3] }
  0x32   :  { %v878_v10 = vld [vmem:[#allocation1 + $0x26b] sm:$0x40]   ;;  %v872_v16 = vsel %vm656_vm3, %v870_v54, %v868_v9  ;;  %v955_v28 = vld [vmem:[#allocation1 + $0x369] sm:$0x80]   ;;  %v953_v31 = vsel %vm664_vm5, %v951_v14, %v949_v27  ;;  %v2010_v33 = vld [vmem:[%s2768_s0 + $0x9a] sm:$0x3] }
  0x33   :  { %v876_v21 = vsel %vm660_vm4, %v874_v55, %v872_v16  ;;  %v2018_v34 = vld [vmem:[%s2768_s0 + $0x8a] sm:$0x3]  ;;  %139 = vst [vmem:[#allocation1 + $0x328] sm:$0x3] %v1986_v32  ;;  %259 = vst [vmem:[#allocation1 + $0x268] sm:$0x3] %v2010_v33  ;;  %v957_v38 = vsel %vm668_vm6, %v955_v28, %v953_v31 }
  0x34   :  { %v880_v25 = vsel %vm664_vm5, %v878_v10, %v876_v21  ;;  %299 = vst [vmem:[#allocation1 + $0x228] sm:$0x3] %v2018_v34  ;;  %v2042_v35 = vld [vmem:[%s2768_s0 + $0x5a] sm:$0x3]  ;;  %v2050_v36 = vld [vmem:[%s2768_s0 + $0x4a] sm:$0x3] }
  0x35   :  { %v884_v30 = vsel %vm668_vm6, %v882_v2, %v880_v25  ;;  %v2074_v37 = vld [vmem:[%s2768_s0 + $0x1a] sm:$0x3]  ;;  %s2108_s16 = smov 96   ;;  %419 = vst [vmem:[#allocation1 + $0x168] sm:$0x3] %v2042_v35  ;;  %s2109_s29 = smov 88  }
  0x36   :  { %885 = vrot.lane.b32.xlu0 %v884_v30, %s2107_s26  ;;  %994 = vrot.lane.b32.xlu1 %v993_v26, %s2108_s16  ;;  %459 = vst [vmem:[#allocation1 + $0x128] sm:$0x3] %v2050_v36  ;;  %579 = vst [vmem:[#allocation1 + $0x68] sm:$0x3] %v2074_v37  ;;  %v2082_v39 = vld [vmem:[%s2768_s0 + $0xa] sm:$0x3] }
  0x37   :  { %619 = vst [vmem:[#allocation1 + $0x28] sm:$0x3] %v2082_v39  ;;  %v1963_v40 = vld [vmem:[%s2768_s0 + $0xf8] sm:$0x3]  ;;  %v1971_v41 = vld [vmem:[%s2768_s0 + $0xe8] sm:$0x3] }
  0x38   :  { %24 = vst [vmem:[#allocation1 + $0x3e0] sm:$0x3] %v1963_v40  ;;  %v1995_v42 = vld [vmem:[%s2768_s0 + $0xb8] sm:$0x3]  ;;  %v2003_v43 = vld [vmem:[%s2768_s0 + $0xa8] sm:$0x3] }
  0x39   :  { %v1040_v44 = vld [vmem:[#allocation1 + $0x1a8] sm:$0x2]   ;;  %64 = vst [vmem:[#allocation1 + $0x3a0] sm:$0x3] %v1971_v41  ;;  %184 = vst [vmem:[#allocation1 + $0x2e0] sm:$0x3] %v1995_v42 }
  0x3a   :  { %958 = vrot.lane.b32.xlu0 %v957_v38, %s2108_s16  ;;  %v1044_v45 = vld [vmem:[#allocation1 + $0x2a7] sm:$0x4]   ;;  %224 = vst [vmem:[#allocation1 + $0x2a0] sm:$0x3] %v2003_v43  ;;  %v1111_v48 = vld [vmem:[#allocation1 + $0xa8] sm:$0x1]  }
  0x3b   :  { %v1048_v46 = vld [vmem:[#allocation1 + $0x3a6] sm:$0x8]   ;;  %v1121_v49 = vld [vmem:[#allocation1 + $0x3a5] sm:$0x8]   ;;  %v2027_v29 = vld [vmem:[%s2768_s0 + $0x78] sm:$0x3] }
  0x3c   :  { %v1038_v47 = vld [vmem:[#allocation1 + $0xa9] sm:$0x1]   ;;  %v1113_v53 = vld [vmem:[#allocation1 + $0x1a7] sm:$0x2]   ;;  %344 = vst [vmem:[#allocation1 + $0x1e0] sm:$0x3] %v2027_v29 }
  0x3d   :  { %v1042_v50 = vsel %vm644_vm0, %v1040_v44, %v1038_v47  ;;  %v1052_v51 = vld [vmem:[#allocation1 + $0xe5] sm:$0x10]   ;;  %v1117_v54 = vld [vmem:[#allocation1 + $0x2a6] sm:$0x4]   ;;  %v1115_v59 = vsel %vm644_vm0, %v1113_v53, %v1111_v48  ;;  %v2059_v33 = vld [vmem:[%s2768_s0 + $0x38] sm:$0x3] }
  0x3e   :  { %v1060_v52 = vld [vmem:[#allocation1 + $0x2e3] sm:$0x40]   ;;  %v1046_v55 = vsel %vm648_vm1, %v1044_v45, %v1042_v50  ;;  %v1133_v60 = vld [vmem:[#allocation1 + $0x2e2] sm:$0x40]   ;;  %v1119_v1 = vsel %vm648_vm1, %v1117_v54, %v1115_v59  ;;  %504 = vst [vmem:[#allocation1 + $0xe0] sm:$0x3] %v2059_v33 }
  0x3f   :  { %v1056_v56 = vld [vmem:[#allocation1 + $0x1e4] sm:$0x20]   ;;  %v1050_v61 = vsel %vm652_vm2, %v1048_v46, %v1046_v55  ;;  %v1123_v4 = vsel %vm652_vm2, %v1121_v49, %v1119_v1  ;;  %v1125_v5 = vld [vmem:[#allocation1 + $0xe4] sm:$0x10]   ;;  %v1979_v41 = vld [vmem:[%s2768_s0 + $0xd8] sm:$0x3] }
  0x40   :  { %v1064_v57 = vld [vmem:[#allocation1 + $0x3e2] sm:$0x80]   ;;  %v1054_v2 = vsel %vm656_vm3, %v1052_v51, %v1050_v61  ;;  %v1129_v6 = vld [vmem:[#allocation1 + $0x1e3] sm:$0x20]   ;;  %v1127_v11 = vsel %vm656_vm3, %v1125_v5, %v1123_v4  ;;  %104 = vst [vmem:[#allocation1 + $0x360] sm:$0x3] %v1979_v41 }
  0x41   :  { %v1008_v58 = vld [vmem:[#allocation1 + $0x227] sm:$0x4]   ;;  %v1137_v7 = vld [vmem:[#allocation1 + $0x3e1] sm:$0x80]   ;;  %v1058_v8 = vsel %vm660_vm4, %v1056_v56, %v1054_v2  ;;  %v1131_v19 = vsel %vm660_vm4, %v1129_v6, %v1127_v11  ;;  %v2011_v45 = vld [vmem:[%s2768_s0 + $0x98] sm:$0x3] }
  0x42   :  { %v1004_v62 = vld [vmem:[#allocation1 + $0x128] sm:$0x2]   ;;  %v1075_v12 = vld [vmem:[#allocation1 + $0x28] sm:$0x1]   ;;  %v1062_v15 = vsel %vm664_vm5, %v1060_v52, %v1058_v8  ;;  %v1135_v25 = vsel %vm664_vm5, %v1133_v60, %v1131_v19  ;;  %v2043_v47 = vld [vmem:[%s2768_s0 + $0x58] sm:$0x3] }
  0x43   :  { %v1012_v63 = vld [vmem:[#allocation1 + $0x326] sm:$0x8]   ;;  %v1077_v13 = vld [vmem:[#allocation1 + $0x127] sm:$0x2]   ;;  %v1066_v23 = vsel %vm668_vm6, %v1064_v57, %v1062_v15  ;;  %v1139_v36 = vsel %vm668_vm6, %v1137_v7, %v1135_v25  ;;  %s2110_s17 = smov 80   ;;  %s2111_s3 = smov 72  }
  0x44   :  { %v1016_v0 = vld [vmem:[#allocation1 + $0x65] sm:$0x10]   ;;  %v1081_v14 = vld [vmem:[#allocation1 + $0x226] sm:$0x4]   ;;  %v1079_v20 = vsel %vm644_vm0, %v1077_v13, %v1075_v12  ;;  %1067 = vrot.lane.b32.xlu1 %v1066_v23, %s2109_s29  ;;  %264 = vst [vmem:[#allocation1 + $0x260] sm:$0x3] %v2011_v45 }
  0x45   :  { %v1002_v3 = vld [vmem:[#allocation1 + $0x29] sm:$0x1]   ;;  %v1085_v21 = vld [vmem:[#allocation1 + $0x325] sm:$0x8]   ;;  %v1083_v26 = vsel %vm648_vm1, %v1081_v14, %v1079_v20  ;;  %424 = vst [vmem:[#allocation1 + $0x160] sm:$0x3] %v2043_v47 }
  0x46   :  { %v1006_v9 = vsel %vm644_vm0, %v1004_v62, %v1002_v3  ;;  %v1024_v10 = vld [vmem:[#allocation1 + $0x263] sm:$0x40]   ;;  %v1089_v22 = vld [vmem:[#allocation1 + $0x64] sm:$0x10]   ;;  %v1087_v31 = vsel %vm652_vm2, %v1085_v21, %v1083_v26  ;;  %v2075_v49 = vld [vmem:[%s2768_s0 + $0x18] sm:$0x3] }
  0x47   :  { %v1010_v16 = vsel %vm648_vm1, %v1008_v58, %v1006_v9  ;;  %v1020_v17 = vld [vmem:[#allocation1 + $0x164] sm:$0x20]   ;;  %v1093_v27 = vld [vmem:[#allocation1 + $0x163] sm:$0x20]   ;;  %v1091_v37 = vsel %vm656_vm3, %v1089_v22, %v1087_v31  ;;  %584 = vst [vmem:[#allocation1 + $0x60] sm:$0x3] %v2075_v49 }
  0x48   :  { %v1028_v18 = vld [vmem:[#allocation1 + $0x362] sm:$0x80]   ;;  %v1014_v24 = vsel %vm652_vm2, %v1012_v63, %v1010_v16  ;;  %v1097_v28 = vld [vmem:[#allocation1 + $0x262] sm:$0x40]   ;;  %v1095_v39 = vsel %vm660_vm4, %v1093_v27, %v1091_v37  ;;  %1140 = vrot.lane.b32.xlu1 %v1139_v36, %s2110_s17  ;;  %v1190_v52 = vld [vmem:[#allocation1 + $0x29f] sm:$0x4]  }
  0x49   :  { %v1018_v30 = vsel %vm656_vm3, %v1016_v0, %v1014_v24  ;;  %v2035_v32 = vld [vmem:[%s2768_s0 + $0x68] sm:$0x3]  ;;  %v1099_v44 = vsel %vm664_vm5, %v1097_v28, %v1095_v39  ;;  %v1194_v53 = vld [vmem:[#allocation1 + $0x39e] sm:$0x8]   ;;  %v1964_v54 = vld [vmem:[%s2768_s0 + $0xf6] sm:$0x3] }
  0x4a   :  { %v2067_v34 = vld [vmem:[%s2768_s0 + $0x28] sm:$0x3]  ;;  %v1022_v35 = vsel %vm660_vm4, %v1020_v17, %v1018_v30  ;;  %384 = vst [vmem:[#allocation1 + $0x1a0] sm:$0x3] %v2035_v32  ;;  %v1263_v55 = vld [vmem:[#allocation1 + $0x29e] sm:$0x4]  }
  0x4b   :  { %544 = vst [vmem:[#allocation1 + $0xa0] sm:$0x3] %v2067_v34  ;;  %v1026_v38 = vsel %vm664_vm5, %v1024_v10, %v1022_v35  ;;  %v1101_v40 = vld [vmem:[#allocation1 + $0x361] sm:$0x80]   ;;  %29 = vst [vmem:[#allocation1 + $0x3d8] sm:$0x3] %v1964_v54 }
  0x4c   :  { %v1987_v42 = vld [vmem:[%s2768_s0 + $0xc8] sm:$0x3]  ;;  %v1030_v43 = vsel %vm668_vm6, %v1028_v18, %v1026_v38  ;;  %v1103_v50 = vsel %vm668_vm6, %v1101_v40, %v1099_v44  ;;  %v1972_v56 = vld [vmem:[%s2768_s0 + $0xe6] sm:$0x3]  ;;  %v1267_v59 = vld [vmem:[#allocation1 + $0x39d] sm:$0x8]  }
  0x4d   :  { %144 = vst [vmem:[#allocation1 + $0x320] sm:$0x3] %v1987_v42  ;;  %v2019_v46 = vld [vmem:[%s2768_s0 + $0x88] sm:$0x3]  ;;  %1031 = vrot.lane.b32.xlu0 %v1030_v43, %s2109_s29  ;;  %69 = vst [vmem:[#allocation1 + $0x398] sm:$0x3] %v1972_v56 }
  0x4e   :  { %304 = vst [vmem:[#allocation1 + $0x220] sm:$0x3] %v2019_v46  ;;  %v2051_v48 = vld [vmem:[%s2768_s0 + $0x48] sm:$0x3]  ;;  %v1198_v61 = vld [vmem:[#allocation1 + $0xdd] sm:$0x10]  }
  0x4f   :  { %464 = vst [vmem:[#allocation1 + $0x120] sm:$0x3] %v2051_v48  ;;  %v2083_v51 = vld [vmem:[%s2768_s0 + $0x8] sm:$0x3]  ;;  %v1206_v62 = vld [vmem:[#allocation1 + $0x2db] sm:$0x40]  }
  0x50   :  { %624 = vst [vmem:[#allocation1 + $0x20] sm:$0x3] %v2083_v51  ;;  %v1202_v2 = vld [vmem:[#allocation1 + $0x1dc] sm:$0x20]   ;;  %v1271_v5 = vld [vmem:[#allocation1 + $0xdc] sm:$0x10]  }
  0x51   :  { %1104 = vrot.lane.b32.xlu0 %v1103_v50, %s2110_s17  ;;  %v1186_v58 = vld [vmem:[#allocation1 + $0x1a0] sm:$0x2]   ;;  %v1259_v0 = vld [vmem:[#allocation1 + $0x19f] sm:$0x2]   ;;  %v1996_v37 = vld [vmem:[%s2768_s0 + $0xb6] sm:$0x3] }
  0x52   :  { %v1184_v57 = vld [vmem:[#allocation1 + $0xa1] sm:$0x1]   ;;  %v1257_v63 = vld [vmem:[#allocation1 + $0xa0] sm:$0x1]   ;;  %v2004_v38 = vld [vmem:[%s2768_s0 + $0xa6] sm:$0x3] }
  0x53   :  { %v1188_v60 = vsel %vm644_vm0, %v1186_v58, %v1184_v57  ;;  %v1210_v3 = vld [vmem:[#allocation1 + $0x3da] sm:$0x80]   ;;  %v1261_v4 = vsel %vm644_vm0, %v1259_v0, %v1257_v63  ;;  %v1279_v6 = vld [vmem:[#allocation1 + $0x2da] sm:$0x40]   ;;  %189 = vst [vmem:[#allocation1 + $0x2d8] sm:$0x3] %v1996_v37 }
  0x54   :  { %v1192_v1 = vsel %vm648_vm1, %v1190_v52, %v1188_v60  ;;  %v1158_v8 = vld [vmem:[#allocation1 + $0x31e] sm:$0x8]   ;;  %v1265_v9 = vsel %vm648_vm1, %v1263_v55, %v1261_v4  ;;  %v1275_v10 = vld [vmem:[#allocation1 + $0x1db] sm:$0x20]   ;;  %229 = vst [vmem:[#allocation1 + $0x298] sm:$0x3] %v2004_v38 }
  0x55   :  { %v1196_v7 = vsel %vm652_vm2, %v1194_v53, %v1192_v1  ;;  %v1231_v11 = vld [vmem:[#allocation1 + $0x31d] sm:$0x8]   ;;  %v1154_v14 = vld [vmem:[#allocation1 + $0x21f] sm:$0x4]   ;;  %v1269_v15 = vsel %vm652_vm2, %v1267_v59, %v1265_v9  ;;  %v2028_v41 = vld [vmem:[%s2768_s0 + $0x76] sm:$0x3] }
  0x56   :  { %v1200_v12 = vsel %vm656_vm3, %v1198_v61, %v1196_v7  ;;  %v1150_v13 = vld [vmem:[#allocation1 + $0x120] sm:$0x2]   ;;  %v1283_v16 = vld [vmem:[#allocation1 + $0x3d9] sm:$0x80]   ;;  %v1273_v21 = vsel %vm656_vm3, %v1271_v5, %v1269_v15  ;;  %v2036_v42 = vld [vmem:[%s2768_s0 + $0x66] sm:$0x3] }
  0x57   :  { %v1223_v17 = vld [vmem:[#allocation1 + $0x11f] sm:$0x2]   ;;  %v1204_v18 = vsel %vm660_vm4, %v1202_v2, %v1200_v12  ;;  %v1148_v19 = vld [vmem:[#allocation1 + $0x21] sm:$0x1]   ;;  %v1277_v28 = vsel %vm660_vm4, %v1275_v10, %v1273_v21  ;;  %v2060_v43 = vld [vmem:[%s2768_s0 + $0x36] sm:$0x3] }
  0x58   :  { %v1166_v20 = vld [vmem:[#allocation1 + $0x15c] sm:$0x20]   ;;  %v1221_v22 = vld [vmem:[#allocation1 + $0x20] sm:$0x1]   ;;  %v1208_v24 = vsel %vm664_vm5, %v1206_v62, %v1204_v18  ;;  %v1152_v25 = vsel %vm644_vm0, %v1150_v13, %v1148_v19  ;;  %v1281_v34 = vsel %vm664_vm5, %v1279_v6, %v1277_v28  ;;  %349 = vst [vmem:[#allocation1 + $0x1d8] sm:$0x3] %v2028_v41 }
  0x59   :  { %v1227_v23 = vld [vmem:[#allocation1 + $0x21e] sm:$0x4]   ;;  %v1162_v26 = vld [vmem:[#allocation1 + $0x5d] sm:$0x10]   ;;  %v1225_v29 = vsel %vm644_vm0, %v1223_v17, %v1221_v22  ;;  %v1212_v32 = vsel %vm668_vm6, %v1210_v3, %v1208_v24  ;;  %v1156_v33 = vsel %vm648_vm1, %v1154_v14, %v1152_v25  ;;  %v1285_v46 = vsel %vm668_vm6, %v1283_v16, %v1281_v34  ;;  %389 = vst [vmem:[#allocation1 + $0x198] sm:$0x3] %v2036_v42 }
  0x5a   :  { %v1170_v27 = vld [vmem:[#allocation1 + $0x25b] sm:$0x40]   ;;  %v1235_v30 = vld [vmem:[#allocation1 + $0x5c] sm:$0x10]   ;;  %v1229_v35 = vsel %vm648_vm1, %v1227_v23, %v1225_v29  ;;  %1213 = vrot.lane.b32.xlu1 %v1212_v32, %s2111_s3  ;;  %v1160_v39 = vsel %vm652_vm2, %v1158_v8, %v1156_v33  ;;  %509 = vst [vmem:[#allocation1 + $0xd8] sm:$0x3] %v2060_v43 }
  0x5b   :  { %v1239_v31 = vld [vmem:[#allocation1 + $0x15b] sm:$0x20]   ;;  %v1233_v40 = vsel %vm652_vm2, %v1231_v11, %v1229_v35  ;;  %v1164_v44 = vsel %vm656_vm3, %v1162_v26, %v1160_v39  ;;  %v1174_v45 = vld [vmem:[#allocation1 + $0x35a] sm:$0x80]   ;;  %v2068_v49 = vld [vmem:[%s2768_s0 + $0x26] sm:$0x3] }
  0x5c   :  { %v1243_v36 = vld [vmem:[#allocation1 + $0x25a] sm:$0x40]   ;;  %v1237_v47 = vsel %vm656_vm3, %v1235_v30, %v1233_v40  ;;  %v1168_v50 = vsel %vm660_vm4, %v1166_v20, %v1164_v44  ;;  %549 = vst [vmem:[#allocation1 + $0x98] sm:$0x3] %v2068_v49  ;;  %v1980_v52 = vld [vmem:[%s2768_s0 + $0xd6] sm:$0x3] }
  0x5d   :  { %v1247_v48 = vld [vmem:[#allocation1 + $0x359] sm:$0x80]   ;;  %v1241_v51 = vsel %vm660_vm4, %v1239_v31, %v1237_v47  ;;  %v1988_v53 = vld [vmem:[%s2768_s0 + $0xc6] sm:$0x3]  ;;  %v2012_v54 = vld [vmem:[%s2768_s0 + $0x96] sm:$0x3]  ;;  %v1172_v55 = vsel %vm664_vm5, %v1170_v27, %v1168_v50 }
  0x5e   :  { %v1245_v56 = vsel %vm664_vm5, %v1243_v36, %v1241_v51  ;;  %109 = vst [vmem:[#allocation1 + $0x358] sm:$0x3] %v1980_v52  ;;  %149 = vst [vmem:[#allocation1 + $0x318] sm:$0x3] %v1988_v53  ;;  %v2020_v57 = vld [vmem:[%s2768_s0 + $0x86] sm:$0x3]  ;;  %v1176_v60 = vsel %vm668_vm6, %v1174_v45, %v1172_v55 }
  0x5f   :  { %269 = vst [vmem:[#allocation1 + $0x258] sm:$0x3] %v2012_v54  ;;  %v2044_v58 = vld [vmem:[%s2768_s0 + $0x56] sm:$0x3]  ;;  %v2052_v59 = vld [vmem:[%s2768_s0 + $0x46] sm:$0x3]  ;;  %1177 = vrot.lane.b32.xlu0 %v1176_v60, %s2111_s3  ;;  %v1249_v0 = vsel %vm668_vm6, %v1247_v48, %v1245_v56 }
  0x60   :  { %s2112_s24 = smov 64   ;;  %309 = vst [vmem:[#allocation1 + $0x218] sm:$0x3] %v2020_v57  ;;  %429 = vst [vmem:[#allocation1 + $0x158] sm:$0x3] %v2044_v58  ;;  %s2113_s12 = smov 56  }
  0x61   :  { %1286 = vrot.lane.b32.xlu1 %v1285_v46, %s2112_s24  ;;  %469 = vst [vmem:[#allocation1 + $0x118] sm:$0x3] %v2052_v59  ;;  %v2076_v61 = vld [vmem:[%s2768_s0 + $0x16] sm:$0x3]  ;;  %v2084_v62 = vld [vmem:[%s2768_s0 + $0x6] sm:$0x3] }
  0x62   :  { %589 = vst [vmem:[#allocation1 + $0x58] sm:$0x3] %v2076_v61  ;;  %629 = vst [vmem:[#allocation1 + $0x18] sm:$0x3] %v2084_v62  ;;  %v1965_v63 = vld [vmem:[%s2768_s0 + $0xf4] sm:$0x3] }
  0x63   :  { %34 = vst [vmem:[#allocation1 + $0x3d0] sm:$0x3] %v1965_v63  ;;  %v1973_v1 = vld [vmem:[%s2768_s0 + $0xe4] sm:$0x3]  ;;  %v1997_v2 = vld [vmem:[%s2768_s0 + $0xb4] sm:$0x3]  ;;  %1250 = vrot.lane.b32.xlu0 %v1249_v0, %s2112_s24 }
  0x64   :  { %v2005_v3 = vld [vmem:[%s2768_s0 + $0xa4] sm:$0x3]  ;;  %v1340_v4 = vld [vmem:[#allocation1 + $0x396] sm:$0x8]   ;;  %v1413_v5 = vld [vmem:[#allocation1 + $0x395] sm:$0x8]  }
  0x65   :  { %74 = vst [vmem:[#allocation1 + $0x390] sm:$0x3] %v1973_v1  ;;  %194 = vst [vmem:[#allocation1 + $0x2d0] sm:$0x3] %v1997_v2  ;;  %v1332_v6 = vld [vmem:[#allocation1 + $0x198] sm:$0x2]  }
  0x66   :  { %234 = vst [vmem:[#allocation1 + $0x290] sm:$0x3] %v2005_v3  ;;  %v1336_v7 = vld [vmem:[#allocation1 + $0x297] sm:$0x4]   ;;  %v1409_v8 = vld [vmem:[#allocation1 + $0x296] sm:$0x4]  }
  0x67   :  { %v1330_v9 = vld [vmem:[#allocation1 + $0x99] sm:$0x1]   ;;  %v1403_v10 = vld [vmem:[#allocation1 + $0x98] sm:$0x1]   ;;  %v2029_v53 = vld [vmem:[%s2768_s0 + $0x74] sm:$0x3] }
  0x68   :  { %v1405_v11 = vld [vmem:[#allocation1 + $0x197] sm:$0x2]   ;;  %v1334_v12 = vsel %vm644_vm0, %v1332_v6, %v1330_v9  ;;  %v1344_v13 = vld [vmem:[#allocation1 + $0xd5] sm:$0x10]   ;;  %v2037_v54 = vld [vmem:[%s2768_s0 + $0x64] sm:$0x3] }
  0x69   :  { %v1348_v14 = vld [vmem:[#allocation1 + $0x1d4] sm:$0x20]   ;;  %v1407_v16 = vsel %vm644_vm0, %v1405_v11, %v1403_v10  ;;  %v1338_v17 = vsel %vm648_vm1, %v1336_v7, %v1334_v12  ;;  %v1417_v28 = vld [vmem:[#allocation1 + $0xd4] sm:$0x10]   ;;  %354 = vst [vmem:[#allocation1 + $0x1d0] sm:$0x3] %v2029_v53 }
  0x6a   :  { %v1352_v15 = vld [vmem:[#allocation1 + $0x2d3] sm:$0x40]   ;;  %v1411_v22 = vsel %vm648_vm1, %v1409_v8, %v1407_v16  ;;  %v1342_v23 = vsel %vm652_vm2, %v1340_v4, %v1338_v17  ;;  %v1421_v32 = vld [vmem:[#allocation1 + $0x1d3] sm:$0x20]   ;;  %394 = vst [vmem:[#allocation1 + $0x190] sm:$0x3] %v2037_v54 }
  0x6b   :  { %v1356_v18 = vld [vmem:[#allocation1 + $0x3d2] sm:$0x80]   ;;  %v1415_v27 = vsel %vm652_vm2, %v1413_v5, %v1411_v22  ;;  %v1346_v29 = vsel %vm656_vm3, %v1344_v13, %v1342_v23  ;;  %v1425_v33 = vld [vmem:[#allocation1 + $0x2d2] sm:$0x40]   ;;  %v2061_v58 = vld [vmem:[%s2768_s0 + $0x34] sm:$0x3] }
  0x6c   :  { %v1296_v19 = vld [vmem:[#allocation1 + $0x118] sm:$0x2]   ;;  %v1419_v31 = vsel %vm656_vm3, %v1417_v28, %v1415_v27  ;;  %v1429_v34 = vld [vmem:[#allocation1 + $0x3d1] sm:$0x80]   ;;  %v1350_v36 = vsel %vm660_vm4, %v1348_v14, %v1346_v29  ;;  %v2069_v59 = vld [vmem:[%s2768_s0 + $0x24] sm:$0x3] }
  0x6d   :  { %v1300_v20 = vld [vmem:[#allocation1 + $0x217] sm:$0x4]   ;;  %v1367_v35 = vld [vmem:[#allocation1 + $0x18] sm:$0x1]   ;;  %v1423_v38 = vsel %vm660_vm4, %v1421_v32, %v1419_v31  ;;  %v1354_v42 = vsel %vm664_vm5, %v1352_v15, %v1350_v36  ;;  %514 = vst [vmem:[#allocation1 + $0xd0] sm:$0x3] %v2061_v58 }
  0x6e   :  { %v1304_v21 = vld [vmem:[#allocation1 + $0x316] sm:$0x8]   ;;  %v1369_v39 = vld [vmem:[#allocation1 + $0x117] sm:$0x2]   ;;  %v1427_v46 = vsel %vm664_vm5, %v1425_v33, %v1423_v38  ;;  %v1358_v49 = vsel %vm668_vm6, %v1356_v18, %v1354_v42  ;;  %554 = vst [vmem:[#allocation1 + $0x90] sm:$0x3] %v2069_v59 }
  0x6f   :  { %v1294_v24 = vld [vmem:[#allocation1 + $0x19] sm:$0x1]   ;;  %v1373_v40 = vld [vmem:[#allocation1 + $0x216] sm:$0x4]   ;;  %v1371_v47 = vsel %vm644_vm0, %v1369_v39, %v1367_v35  ;;  %1359 = vrot.lane.b32.xlu1 %v1358_v49, %s2113_s12  ;;  %v1431_v61 = vsel %vm668_vm6, %v1429_v34, %v1427_v46  ;;  %v1981_v2 = vld [vmem:[%s2768_s0 + $0xd4] sm:$0x3] }
  0x70   :  { %v1308_v25 = vld [vmem:[#allocation1 + $0x55] sm:$0x10]   ;;  %v1298_v30 = vsel %vm644_vm0, %v1296_v19, %v1294_v24  ;;  %v1377_v41 = vld [vmem:[#allocation1 + $0x315] sm:$0x8]   ;;  %v1375_v51 = vsel %vm648_vm1, %v1373_v40, %v1371_v47  ;;  %v1989_v3 = vld [vmem:[%s2768_s0 + $0xc4] sm:$0x3] }
  0x71   :  { %v1312_v26 = vld [vmem:[#allocation1 + $0x154] sm:$0x20]   ;;  %v1302_v37 = vsel %vm648_vm1, %v1300_v20, %v1298_v30  ;;  %v1381_v48 = vld [vmem:[#allocation1 + $0x54] sm:$0x10]   ;;  %v1379_v56 = vsel %vm652_vm2, %v1377_v41, %v1375_v51  ;;  %v2013_v4 = vld [vmem:[%s2768_s0 + $0x94] sm:$0x3] }
  0x72   :  { %v1306_v43 = vsel %vm652_vm2, %v1304_v21, %v1302_v37  ;;  %v1316_v44 = vld [vmem:[#allocation1 + $0x253] sm:$0x40]   ;;  %v1385_v52 = vld [vmem:[#allocation1 + $0x153] sm:$0x20]   ;;  %v1383_v62 = vsel %vm656_vm3, %v1381_v48, %v1379_v56  ;;  %114 = vst [vmem:[#allocation1 + $0x350] sm:$0x3] %v1981_v2 }
  0x73   :  { %v1320_v45 = vld [vmem:[#allocation1 + $0x352] sm:$0x80]   ;;  %v1310_v50 = vsel %vm656_vm3, %v1308_v25, %v1306_v43  ;;  %v1389_v57 = vld [vmem:[#allocation1 + $0x252] sm:$0x40]   ;;  %v1387_v1 = vsel %vm660_vm4, %v1385_v52, %v1383_v62  ;;  %154 = vst [vmem:[#allocation1 + $0x310] sm:$0x3] %v1989_v3 }
  0x74   :  { %v1314_v55 = vsel %vm660_vm4, %v1312_v26, %v1310_v50  ;;  %v1393_v63 = vld [vmem:[#allocation1 + $0x351] sm:$0x80]   ;;  %v1391_v5 = vsel %vm664_vm5, %v1389_v57, %v1387_v1  ;;  %274 = vst [vmem:[#allocation1 + $0x250] sm:$0x3] %v2013_v4  ;;  %v2021_v6 = vld [vmem:[%s2768_s0 + $0x84] sm:$0x3] }
  0x75   :  { %v1318_v60 = vsel %vm664_vm5, %v1316_v44, %v1314_v55  ;;  %v2045_v7 = vld [vmem:[%s2768_s0 + $0x54] sm:$0x3]  ;;  %v2053_v8 = vld [vmem:[%s2768_s0 + $0x44] sm:$0x3]  ;;  %s2114_s29 = smov 48   ;;  %v1395_v9 = vsel %vm668_vm6, %v1393_v63, %v1391_v5  ;;  %s2115_s15 = smov 40  }
  0x76   :  { %v1322_v0 = vsel %vm668_vm6, %v1320_v45, %v1318_v60  ;;  %1432 = vrot.lane.b32.xlu1 %v1431_v61, %s2114_s29  ;;  %314 = vst [vmem:[#allocation1 + $0x210] sm:$0x3] %v2021_v6  ;;  %434 = vst [vmem:[#allocation1 + $0x150] sm:$0x3] %v2045_v7  ;;  %v2077_v10 = vld [vmem:[%s2768_s0 + $0x14] sm:$0x3] }
  0x77   :  { %1323 = vrot.lane.b32.xlu0 %v1322_v0, %s2113_s12  ;;  %474 = vst [vmem:[#allocation1 + $0x110] sm:$0x3] %v2053_v8  ;;  %v2085_v11 = vld [vmem:[%s2768_s0 + $0x4] sm:$0x3]  ;;  %v1482_v12 = vld [vmem:[#allocation1 + $0x28f] sm:$0x4]  }
  0x78   :  { %594 = vst [vmem:[#allocation1 + $0x50] sm:$0x3] %v2077_v10  ;;  %634 = vst [vmem:[#allocation1 + $0x10] sm:$0x3] %v2085_v11  ;;  %v1486_v13 = vld [vmem:[#allocation1 + $0x38e] sm:$0x8]  }
  0x79   :  { %v1966_v14 = vld [vmem:[%s2768_s0 + $0xf2] sm:$0x3]  ;;  %v1974_v15 = vld [vmem:[%s2768_s0 + $0xe2] sm:$0x3]  ;;  %v1478_v16 = vld [vmem:[#allocation1 + $0x190] sm:$0x2]  }
  0x7a   :  { %v1551_v17 = vld [vmem:[#allocation1 + $0x18f] sm:$0x2]   ;;  %39 = vst [vmem:[#allocation1 + $0x3c8] sm:$0x3] %v1966_v14  ;;  %79 = vst [vmem:[#allocation1 + $0x388] sm:$0x3] %v1974_v15 }
  0x7b   :  { %1396 = vrot.lane.b32.xlu0 %v1395_v9, %s2114_s29  ;;  %v1555_v18 = vld [vmem:[#allocation1 + $0x28e] sm:$0x4]   ;;  %v1476_v19 = vld [vmem:[#allocation1 + $0x91] sm:$0x1]   ;;  %v1998_v27 = vld [vmem:[%s2768_s0 + $0xb2] sm:$0x3] }
  0x7c   :  { %v1549_v20 = vld [vmem:[#allocation1 + $0x90] sm:$0x1]   ;;  %v1480_v22 = vsel %vm644_vm0, %v1478_v16, %v1476_v19  ;;  %v1490_v23 = vld [vmem:[#allocation1 + $0xcd] sm:$0x10]   ;;  %199 = vst [vmem:[#allocation1 + $0x2c8] sm:$0x3] %v1998_v27 }
  0x7d   :  { %v1559_v21 = vld [vmem:[#allocation1 + $0x38d] sm:$0x8]   ;;  %v1498_v24 = vld [vmem:[#allocation1 + $0x2cb] sm:$0x40]   ;;  %v1553_v25 = vsel %vm644_vm0, %v1551_v17, %v1549_v20  ;;  %v1484_v28 = vsel %vm648_vm1, %v1482_v12, %v1480_v22  ;;  %v2006_v0 = vld [vmem:[%s2768_s0 + $0xa2] sm:$0x3] }
  0x7e   :  { %v1563_v26 = vld [vmem:[#allocation1 + $0xcc] sm:$0x10]   ;;  %v1494_v29 = vld [vmem:[#allocation1 + $0x1cc] sm:$0x20]   ;;  %v1557_v31 = vsel %vm648_vm1, %v1555_v18, %v1553_v25  ;;  %v1488_v34 = vsel %vm652_vm2, %v1486_v13, %v1484_v28  ;;  %v2030_v1 = vld [vmem:[%s2768_s0 + $0x72] sm:$0x3] }
  0x7f   :  { %v1502_v30 = vld [vmem:[#allocation1 + $0x3ca] sm:$0x80]   ;;  %v1567_v32 = vld [vmem:[#allocation1 + $0x1cb] sm:$0x20]   ;;  %v1561_v38 = vsel %vm652_vm2, %v1559_v21, %v1557_v31  ;;  %v1492_v39 = vsel %vm656_vm3, %v1490_v23, %v1488_v34  ;;  %239 = vst [vmem:[#allocation1 + $0x288] sm:$0x3] %v2006_v0 }
  0x80   :  { %v1571_v33 = vld [vmem:[#allocation1 + $0x2ca] sm:$0x40]   ;;  %v1442_v35 = vld [vmem:[#allocation1 + $0x110] sm:$0x2]   ;;  %v1565_v42 = vsel %vm656_vm3, %v1563_v26, %v1561_v38  ;;  %v1496_v45 = vsel %vm660_vm4, %v1494_v29, %v1492_v39  ;;  %359 = vst [vmem:[#allocation1 + $0x1c8] sm:$0x3] %v2030_v1 }
  0x81   :  { %v1446_v36 = vld [vmem:[#allocation1 + $0x20f] sm:$0x4]   ;;  %v1575_v43 = vld [vmem:[#allocation1 + $0x3c9] sm:$0x80]   ;;  %v1569_v48 = vsel %vm660_vm4, %v1567_v32, %v1565_v42  ;;  %v1500_v52 = vsel %vm664_vm5, %v1498_v24, %v1496_v45  ;;  %v2038_v4 = vld [vmem:[%s2768_s0 + $0x62] sm:$0x3] }
  0x82   :  { %v1450_v37 = vld [vmem:[#allocation1 + $0x30e] sm:$0x8]   ;;  %v1513_v44 = vld [vmem:[#allocation1 + $0x10] sm:$0x1]   ;;  %v1573_v56 = vsel %vm664_vm5, %v1571_v33, %v1569_v48  ;;  %v1504_v60 = vsel %vm668_vm6, %v1502_v30, %v1500_v52  ;;  %v2062_v5 = vld [vmem:[%s2768_s0 + $0x32] sm:$0x3] }
  0x83   :  { %v1440_v40 = vld [vmem:[#allocation1 + $0x11] sm:$0x1]   ;;  %v1515_v49 = vld [vmem:[#allocation1 + $0x10f] sm:$0x2]   ;;  %1505 = vrot.lane.b32.xlu1 %v1504_v60, %s2115_s15  ;;  %v2070_v6 = vld [vmem:[%s2768_s0 + $0x22] sm:$0x3]  ;;  %v1577_v8 = vsel %vm668_vm6, %v1575_v43, %v1573_v56 }
  0x84   :  { %v1454_v41 = vld [vmem:[#allocation1 + $0x4d] sm:$0x10]   ;;  %v1444_v46 = vsel %vm644_vm0, %v1442_v35, %v1440_v40  ;;  %v1519_v50 = vld [vmem:[#allocation1 + $0x20e] sm:$0x4]   ;;  %v1517_v57 = vsel %vm644_vm0, %v1515_v49, %v1513_v44  ;;  %399 = vst [vmem:[#allocation1 + $0x188] sm:$0x3] %v2038_v4 }
  0x85   :  { %v1462_v47 = vld [vmem:[#allocation1 + $0x24b] sm:$0x40]   ;;  %v1523_v51 = vld [vmem:[#allocation1 + $0x30d] sm:$0x8]   ;;  %v1448_v53 = vsel %vm648_vm1, %v1446_v36, %v1444_v46  ;;  %v1521_v62 = vsel %vm648_vm1, %v1519_v50, %v1517_v57  ;;  %519 = vst [vmem:[#allocation1 + $0xc8] sm:$0x3] %v2062_v5 }
  0x86   :  { %v1458_v54 = vld [vmem:[#allocation1 + $0x14c] sm:$0x20]   ;;  %v1527_v58 = vld [vmem:[#allocation1 + $0x4c] sm:$0x10]   ;;  %v1452_v61 = vsel %vm652_vm2, %v1450_v37, %v1448_v53  ;;  %v1525_v3 = vsel %vm652_vm2, %v1523_v51, %v1521_v62  ;;  %559 = vst [vmem:[#allocation1 + $0x88] sm:$0x3] %v2070_v6 }
  0x87   :  { %v1466_v55 = vld [vmem:[#allocation1 + $0x34a] sm:$0x80]   ;;  %v1531_v59 = vld [vmem:[#allocation1 + $0x14b] sm:$0x20]   ;;  %v1456_v2 = vsel %vm656_vm3, %v1454_v41, %v1452_v61  ;;  %v1529_v9 = vsel %vm656_vm3, %v1527_v58, %v1525_v3  ;;  %v1982_v13 = vld [vmem:[%s2768_s0 + $0xd2] sm:$0x3] }
  0x88   :  { %v1535_v63 = vld [vmem:[#allocation1 + $0x24a] sm:$0x40]   ;;  %v1460_v7 = vsel %vm660_vm4, %v1458_v54, %v1456_v2  ;;  %v1533_v12 = vsel %vm660_vm4, %v1531_v59, %v1529_v9  ;;  %v1990_v14 = vld [vmem:[%s2768_s0 + $0xc2] sm:$0x3]  ;;  %v2014_v15 = vld [vmem:[%s2768_s0 + $0x92] sm:$0x3] }
  0x89   :  { %v1539_v10 = vld [vmem:[#allocation1 + $0x349] sm:$0x80]   ;;  %v1464_v11 = vsel %vm664_vm5, %v1462_v47, %v1460_v7  ;;  %v1537_v17 = vsel %vm664_vm5, %v1535_v63, %v1533_v12  ;;  %119 = vst [vmem:[#allocation1 + $0x348] sm:$0x3] %v1982_v13  ;;  %159 = vst [vmem:[#allocation1 + $0x308] sm:$0x3] %v1990_v14 }
  0x8a   :  { %v1468_v16 = vsel %vm668_vm6, %v1466_v55, %v1464_v11  ;;  %279 = vst [vmem:[#allocation1 + $0x248] sm:$0x3] %v2014_v15  ;;  %v2022_v18 = vld [vmem:[%s2768_s0 + $0x82] sm:$0x3]  ;;  %v2046_v19 = vld [vmem:[%s2768_s0 + $0x52] sm:$0x3]  ;;  %v1541_v23 = vsel %vm668_vm6, %v1539_v10, %v1537_v17 }
  0x8b   :  { %v2054_v20 = vld [vmem:[%s2768_s0 + $0x42] sm:$0x3]  ;;  %1469 = vrot.lane.b32.xlu0 %v1468_v16, %s2115_s15  ;;  %s2116_s5 = smov 32   ;;  %319 = vst [vmem:[#allocation1 + $0x208] sm:$0x3] %v2022_v18  ;;  %s2117_s18 = smov 24  }
  0x8c   :  { %1578 = vrot.lane.b32.xlu1 %v1577_v8, %s2116_s5  ;;  %439 = vst [vmem:[#allocation1 + $0x148] sm:$0x3] %v2046_v19  ;;  %479 = vst [vmem:[#allocation1 + $0x108] sm:$0x3] %v2054_v20  ;;  %v2078_v21 = vld [vmem:[%s2768_s0 + $0x12] sm:$0x3] }
  0x8d   :  { %v2086_v22 = vld [vmem:[%s2768_s0 + $0x2] sm:$0x3]  ;;  %599 = vst [vmem:[#allocation1 + $0x48] sm:$0x3] %v2078_v21  ;;  %v1632_v24 = vld [vmem:[#allocation1 + $0x386] sm:$0x8]  }
  0x8e   :  { %638 = vst [vmem:[#allocation1 + $0x8] sm:$0x3] %v2086_v22  ;;  %v1967_v25 = vld [vmem:[%s2768_s0 + $0xf0] sm:$0x3]  ;;  %v1975_v26 = vld [vmem:[%s2768_s0 + $0xe0] sm:$0x3] }
  0x8f   :  { %v1983_v27 = vld [vmem:[%s2768_s0 + $0xd0] sm:$0x3]  ;;  %v1628_v28 = vld [vmem:[#allocation1 + $0x287] sm:$0x4]   ;;  %v1705_v29 = vld [vmem:[#allocation1 + $0x385] sm:$0x8]   ;;  %1542 = vrot.lane.b32.xlu0 %v1541_v23, %s2116_s5 }
  0x90   :  { %44 = vst [vmem:[#allocation1 + $0x3c0] sm:$0x3] %v1967_v25  ;;  %84 = vst [vmem:[#allocation1 + $0x380] sm:$0x3] %v1975_v26  ;;  %v1622_v30 = vld [vmem:[#allocation1 + $0x89] sm:$0x1]  }
  0x91   :  { %124 = vst [vmem:[#allocation1 + $0x340] sm:$0x3] %v1983_v27  ;;  %v1624_v31 = vld [vmem:[#allocation1 + $0x188] sm:$0x2]   ;;  %v1701_v32 = vld [vmem:[#allocation1 + $0x286] sm:$0x4]  }
  0x92   :  { %v1626_v33 = vsel %vm644_vm0, %v1624_v31, %v1622_v30  ;;  %v1636_v34 = vld [vmem:[#allocation1 + $0xc5] sm:$0x10]   ;;  %v1695_v36 = vld [vmem:[#allocation1 + $0x88] sm:$0x1]   ;;  %v1991_v12 = vld [vmem:[%s2768_s0 + $0xc0] sm:$0x3] }
  0x93   :  { %v1644_v35 = vld [vmem:[#allocation1 + $0x2c3] sm:$0x40]   ;;  %v1697_v37 = vld [vmem:[#allocation1 + $0x187] sm:$0x2]   ;;  %v1630_v38 = vsel %vm648_vm1, %v1628_v28, %v1626_v33  ;;  %164 = vst [vmem:[#allocation1 + $0x300] sm:$0x3] %v1991_v12 }
  0x94   :  { %v1640_v39 = vld [vmem:[#allocation1 + $0x1c4] sm:$0x20]   ;;  %v1699_v41 = vsel %vm644_vm0, %v1697_v37, %v1695_v36  ;;  %v1709_v42 = vld [vmem:[#allocation1 + $0xc4] sm:$0x10]   ;;  %v1634_v44 = vsel %vm652_vm2, %v1632_v24, %v1630_v38  ;;  %v1999_v16 = vld [vmem:[%s2768_s0 + $0xb0] sm:$0x3] }
  0x95   :  { %v1648_v40 = vld [vmem:[#allocation1 + $0x3c2] sm:$0x80]   ;;  %v1717_v43 = vld [vmem:[#allocation1 + $0x2c2] sm:$0x40]   ;;  %v1703_v48 = vsel %vm648_vm1, %v1701_v32, %v1699_v41  ;;  %v1638_v49 = vsel %vm656_vm3, %v1636_v34, %v1634_v44  ;;  %v2007_v17 = vld [vmem:[%s2768_s0 + $0xa0] sm:$0x3] }
  0x96   :  { %v1588_v45 = vld [vmem:[#allocation1 + $0x108] sm:$0x2]   ;;  %v1707_v52 = vsel %vm652_vm2, %v1705_v29, %v1703_v48  ;;  %v1713_v53 = vld [vmem:[#allocation1 + $0x1c3] sm:$0x20]   ;;  %v1642_v55 = vsel %vm660_vm4, %v1640_v39, %v1638_v49  ;;  %v2015_v18 = vld [vmem:[%s2768_s0 + $0x90] sm:$0x3] }
  0x97   :  { %v1592_v46 = vld [vmem:[#allocation1 + $0x207] sm:$0x4]   ;;  %v1721_v54 = vld [vmem:[#allocation1 + $0x3c1] sm:$0x80]   ;;  %v1711_v58 = vsel %vm656_vm3, %v1709_v42, %v1707_v52  ;;  %v1646_v62 = vsel %vm664_vm5, %v1644_v35, %v1642_v55  ;;  %204 = vst [vmem:[#allocation1 + $0x2c0] sm:$0x3] %v1999_v16 }
  0x98   :  { %v1596_v47 = vld [vmem:[#allocation1 + $0x306] sm:$0x8]   ;;  %v1659_v59 = vld [vmem:[#allocation1 + $0x8] sm:$0x1]   ;;  %v1715_v2 = vsel %vm660_vm4, %v1713_v53, %v1711_v58  ;;  %v1650_v6 = vsel %vm668_vm6, %v1648_v40, %v1646_v62  ;;  %244 = vst [vmem:[#allocation1 + $0x280] sm:$0x3] %v2007_v17 }
  0x99   :  { %v1586_v50 = vld [vmem:[#allocation1 + $0x9] sm:$0x1]   ;;  %v1661_v60 = vld [vmem:[#allocation1 + $0x107] sm:$0x2]   ;;  %v1719_v8 = vsel %vm664_vm5, %v1717_v43, %v1715_v2  ;;  %1651 = vrot.lane.b32.xlu1 %v1650_v6, %s2117_s18  ;;  %284 = vst [vmem:[#allocation1 + $0x240] sm:$0x3] %v2015_v18 }
  0x9a   :  { %v1600_v51 = vld [vmem:[#allocation1 + $0x45] sm:$0x10]   ;;  %v1590_v56 = vsel %vm644_vm0, %v1588_v45, %v1586_v50  ;;  %v1665_v61 = vld [vmem:[#allocation1 + $0x206] sm:$0x4]   ;;  %v1663_v3 = vsel %vm644_vm0, %v1661_v60, %v1659_v59  ;;  %v1723_v20 = vsel %vm668_vm6, %v1721_v54, %v1719_v8  ;;  %v2023_v22 = vld [vmem:[%s2768_s0 + $0x80] sm:$0x3] }
  0x9b   :  { %v1608_v57 = vld [vmem:[#allocation1 + $0x243] sm:$0x40]   ;;  %v1594_v63 = vsel %vm648_vm1, %v1592_v46, %v1590_v56  ;;  %v1669_v4 = vld [vmem:[#allocation1 + $0x305] sm:$0x8]   ;;  %v1667_v9 = vsel %vm648_vm1, %v1665_v61, %v1663_v3  ;;  %v2031_v23 = vld [vmem:[%s2768_s0 + $0x70] sm:$0x3] }
  0x9c   :  { %v1604_v0 = vld [vmem:[#allocation1 + $0x144] sm:$0x20]   ;;  %v1673_v5 = vld [vmem:[#allocation1 + $0x44] sm:$0x10]   ;;  %v1598_v7 = vsel %vm652_vm2, %v1596_v47, %v1594_v63  ;;  %v1671_v14 = vsel %vm652_vm2, %v1669_v4, %v1667_v9  ;;  %v2039_v24 = vld [vmem:[%s2768_s0 + $0x60] sm:$0x3] }
  0x9d   :  { %v1612_v1 = vld [vmem:[#allocation1 + $0x342] sm:$0x80]   ;;  %v1677_v10 = vld [vmem:[#allocation1 + $0x143] sm:$0x20]   ;;  %v1602_v13 = vsel %vm656_vm3, %v1600_v51, %v1598_v7  ;;  %v1675_v21 = vsel %vm656_vm3, %v1673_v5, %v1671_v14  ;;  %324 = vst [vmem:[#allocation1 + $0x200] sm:$0x3] %v2023_v22  ;;  %v740_v22 = vpop.permute.xlu0 %739  }
  0x9e   :  { %v1681_v11 = vld [vmem:[#allocation1 + $0x242] sm:$0x40]   ;;  %v1606_v19 = vsel %vm660_vm4, %v1604_v0, %v1602_v13  ;;  %v1679_v26 = vsel %vm660_vm4, %v1677_v10, %v1675_v21  ;;  %364 = vst [vmem:[#allocation1 + $0x1c0] sm:$0x3] %v2031_v23  ;;  %404 = vst [vmem:[#allocation1 + $0x180] sm:$0x3] %v2039_v24 }
  0x9f   :  { %v1685_v15 = vld [vmem:[#allocation1 + $0x341] sm:$0x80]   ;;  %v1610_v25 = vsel %vm664_vm5, %v1608_v57, %v1606_v19  ;;  %v2063_v27 = vld [vmem:[%s2768_s0 + $0x30] sm:$0x3]  ;;  %v2071_v28 = vld [vmem:[%s2768_s0 + $0x20] sm:$0x3]  ;;  %v1683_v31 = vsel %vm664_vm5, %v1681_v11, %v1679_v26 }
  0xa0   :  { %v2079_v29 = vld [vmem:[%s2768_s0 + $0x10] sm:$0x3]  ;;  %v1614_v30 = vsel %vm668_vm6, %v1612_v1, %v1610_v25  ;;  %524 = vst [vmem:[#allocation1 + $0xc0] sm:$0x3] %v2063_v27  ;;  %564 = vst [vmem:[#allocation1 + $0x80] sm:$0x3] %v2071_v28  ;;  %v1687_v33 = vsel %vm668_vm6, %v1685_v15, %v1683_v31  ;;  %v813_v15 = vpop.permute.xlu1 %812  }
  0xa1   :  { %604 = vst [vmem:[#allocation1 + $0x40] sm:$0x3] %v2079_v29  ;;  %v639_v32 = vld [vmem:[%s2768_s0] sm:$0x3]  ;;  %1615 = vrot.lane.b32.xlu0 %v1614_v30, %s2117_s18  ;;  %s2118_s10 = smov 16   ;;  %vm670_vm7 = vcmask 64512  }
  0xa2   :  { %1724 = vrot.lane.b32.xlu1 %v1723_v20, %s2118_s10  ;;  %640 = vst [vmem:[#allocation1] sm:$0x3] %v639_v32  ;;  %v2047_v34 = vld [vmem:[%s2768_s0 + $0x50] sm:$0x3]  ;;  %v2055_v35 = vld [vmem:[%s2768_s0 + $0x40] sm:$0x3] }
  0xa3   :  { %444 = vst [vmem:[#allocation1 + $0x140] sm:$0x3] %v2047_v34  ;;  %484 = vst [vmem:[#allocation1 + $0x100] sm:$0x3] %v2055_v35  ;;  %v677_v36 = vld [vmem:[#allocation1 + $0x23f] sm:$0x2]   ;;  %v776_v35 = vpop.permute.xlu0 %775  }
  0xa4   :  { %v681_v37 = vld [vmem:[#allocation1 + $0x27e] sm:$0x4]   ;;  %v1778_v43 = vld [vmem:[#allocation1 + $0x37e] sm:$0x8]   ;;  %vm741_vm8 = vcmask 1048512   ;;  %vm814_vm9 = vcmask 982912   ;;  %v849_v32 = vpop.permute.xlu1 %848  }
  0xa5   :  { %1688 = vrot.lane.b32.xlu0 %v1687_v33, %s2118_s10  ;;  %v689_v38 = vld [vmem:[#allocation1 + $0x2fc] sm:$0x10]   ;;  %v1770_v42 = vld [vmem:[#allocation1 + $0x180] sm:$0x2]   ;;  %s2119_s0 = smov 8   ;;  %vm887_vm10 = vcmask 917312  }
  0xa6   :  { %v675_v39 = vld [vmem:[#allocation1 + $0x200] sm:$0x1]   ;;  %v1774_v53 = vld [vmem:[#allocation1 + $0x27f] sm:$0x4]   ;;  %vm960_vm11 = vcmask 851712   ;;  %vm1033_vm12 = vcmask 786112  }
  0xa7   :  { %v685_v40 = vld [vmem:[#allocation1 + $0x2bd] sm:$0x8]   ;;  %v679_v47 = vsel %vm644_vm0, %v677_v36, %v675_v39  ;;  %v1768_v52 = vld [vmem:[#allocation1 + $0x81] sm:$0x1]   ;;  %vm1106_vm13 = vcmask 720512   ;;  %vm1179_vm14 = vcmask 654912  }
  0xa8   :  { %v693_v41 = vld [vmem:[#allocation1 + $0x33b] sm:$0x20]   ;;  %v683_v50 = vsel %vm648_vm1, %v681_v37, %v679_v47  ;;  %v1772_v56 = vsel %vm644_vm0, %v1770_v42, %v1768_v52  ;;  %v1782_v57 = vld [vmem:[#allocation1 + $0xbd] sm:$0x10]   ;;  %v922_v36 = vpop.permute.xlu1 %921   ;;  %v886_v37 = vpop.permute.xlu0 %885   ;;  %vm1252_vm15 = vcmask 589312  }
  0xa9   :  { %v643_v44 = vld [vmem:[#allocation1 + $0x3f] sm:$0x2]   ;;  %v687_v55 = vsel %vm652_vm2, %v685_v40, %v683_v50  ;;  %v1786_v58 = vld [vmem:[#allocation1 + $0x1bc] sm:$0x20]   ;;  %v1776_v62 = vsel %vm648_vm1, %v1774_v53, %v1772_v56 }
  0xaa   :  { %v647_v45 = vld [vmem:[#allocation1 + $0x7e] sm:$0x4]   ;;  %v1742_v59 = vld [vmem:[#allocation1 + $0x2fe] sm:$0x8]   ;;  %v691_v61 = vsel %vm656_vm3, %v689_v38, %v687_v55  ;;  %v1780_v5 = vsel %vm652_vm2, %v1778_v43, %v1776_v62 }
  0xab   :  { %v651_v46 = vld [vmem:[#allocation1 + $0xbd] sm:$0x8]   ;;  %v1794_v63 = vld [vmem:[#allocation1 + $0x3ba] sm:$0x80]   ;;  %v695_v4 = vsel %vm660_vm4, %v693_v41, %v691_v61  ;;  %v1784_v11 = vsel %vm656_vm3, %v1782_v57, %v1780_v5 }
  0xac   :  { %v697_v48 = vld [vmem:[#allocation1 + $0x37a] sm:$0x40]   ;;  %v1732_v2 = vld [vmem:[#allocation1 + $0x1] sm:$0x1]   ;;  %v1788_v18 = vsel %vm660_vm4, %v1786_v58, %v1784_v11  ;;  %v995_v38 = vpop.permute.xlu1 %994   ;;  %v959_v39 = vpop.permute.xlu0 %958  }
  0xad   :  { %v641_v49 = vld [vmem:[#allocation1] sm:$0x1]   ;;  %v1790_v6 = vld [vmem:[#allocation1 + $0x2bb] sm:$0x40]   ;;  %v699_v10 = vsel %vm664_vm5, %v697_v48, %v695_v4 }
  0xae   :  { %v701_v51 = vld [vmem:[#allocation1 + $0x3b9] sm:$0x80]   ;;  %v645_v54 = vsel %vm644_vm0, %v643_v44, %v641_v49  ;;  %v1734_v7 = vld [vmem:[#allocation1 + $0x100] sm:$0x2]   ;;  %v1792_v23 = vsel %vm664_vm5, %v1790_v6, %v1788_v18 }
  0xaf   :  { %v649_v60 = vsel %vm648_vm1, %v647_v45, %v645_v54  ;;  %v655_v0 = vld [vmem:[#allocation1 + $0xfc] sm:$0x10]   ;;  %v1738_v8 = vld [vmem:[#allocation1 + $0x1ff] sm:$0x4]   ;;  %v1736_v13 = vsel %vm644_vm0, %v1734_v7, %v1732_v2  ;;  %v703_v17 = vsel %vm668_vm6, %v701_v51, %v699_v10  ;;  %v1796_v27 = vsel %vm668_vm6, %v1794_v63, %v1792_v23 }
  0xb0   :  { %v659_v1 = vld [vmem:[#allocation1 + $0x13b] sm:$0x20]   ;;  %v653_v3 = vsel %vm652_vm2, %v651_v46, %v649_v60  ;;  %v1746_v14 = vld [vmem:[#allocation1 + $0x3d] sm:$0x10]   ;;  %v1740_v20 = vsel %vm648_vm1, %v1738_v8, %v1736_v13  ;;  %1797 = vrot.lane.b32.xlu1 %v1796_v27, %s2119_s0  ;;  %vm1325_vm0 = vcmask 523712   ;;  %vm1398_vm1 = vcmask 458112  }
  0xb1   :  { %v667_v9 = vld [vmem:[#allocation1 + $0x1b9] sm:$0x80]   ;;  %v657_v12 = vsel %vm656_vm3, %v655_v0, %v653_v3  ;;  %v1750_v21 = vld [vmem:[#allocation1 + $0x13c] sm:$0x20]   ;;  %v1744_v24 = vsel %vm652_vm2, %v1742_v59, %v1740_v20  ;;  %vm1471_vm2 = vcmask 392512  }
  0xb2   :  { %v663_v16 = vld [vmem:[#allocation1 + $0x17a] sm:$0x40]   ;;  %v661_v19 = vsel %vm660_vm4, %v659_v1, %v657_v12  ;;  %v1754_v25 = vld [vmem:[#allocation1 + $0x23b] sm:$0x40]   ;;  %v1748_v28 = vsel %vm656_vm3, %v1746_v14, %v1744_v24  ;;  %vm1544_vm3 = vcmask 326912  }
  0xb3   :  { %v665_v26 = vsel %vm664_vm5, %v663_v16, %v661_v19  ;;  %706 = vst.msk [vmem:[#allocation0 + $0x2] ss:$8 sm:$0xf] %vm670_vm7, %v703_v17   ;;  %708 = vst.msk [vmem:[#allocation0 - $0x1d] ss:$8 sm:$0xf0] %vm670_vm7, %v703_v17   ;;  %v1752_v31 = vsel %vm660_vm4, %v1750_v21, %v1748_v28 }
  0xb4   :  { %v1758_v29 = vld [vmem:[#allocation1 + $0x33a] sm:$0x80]   ;;  %v669_v30 = vsel %vm668_vm6, %v667_v9, %v665_v26  ;;  %v1756_v33 = vsel %vm664_vm5, %v1754_v25, %v1752_v31  ;;  %vm1617_vm4 = vcmask 261312   ;;  %vm1690_vm5 = vcmask 195712  }
  0xb5   :  { %671 = vst.msk [vmem:[#allocation0] ss:$8 sm:$0xf] %vm670_vm7, %v669_v30   ;;  %673 = vst.msk [vmem:[#allocation0 - $0x1f] ss:$8 sm:$0xf0] %vm670_vm7, %v669_v30   ;;  %v1760_v34 = vsel %vm668_vm6, %v1758_v29, %v1756_v33 }
  0xb6   :  { %742 = vst.msk [vmem:[#allocation0] sm:$0xf] %vm741_vm8, %v740_v22   ;;  %744 = vst.msk [vmem:[#allocation0 + $0x4] sm:$0xf0] %vm741_vm8, %v740_v22   ;;  %1761 = vrot.lane.b32.xlu0 %v1760_v34, %s2119_s0  ;;  %v1068_v40 = vpop.permute.xlu1 %1067   ;;  %vm1763_vm6 = vcmask 130112  }
  0xb7   :  { %815 = vst.msk [vmem:[#allocation0] sm:$0xf] %vm814_vm9, %v813_v15   ;;  %817 = vst.msk [vmem:[#allocation0 + $0x4] sm:$0xf0] %vm814_vm9, %v813_v15  }
  0xb8   :  { %779 = vst.msk [vmem:[#allocation0 + $0x10] sm:$0xf] %vm741_vm8, %v776_v35   ;;  %781 = vst.msk [vmem:[#allocation0 + $0x14] sm:$0xf0] %vm741_vm8, %v776_v35  }
  0xb9   :  { %852 = vst.msk [vmem:[#allocation0 + $0x10] sm:$0xf] %vm814_vm9, %v849_v32   ;;  %854 = vst.msk [vmem:[#allocation0 + $0x14] sm:$0xf0] %vm814_vm9, %v849_v32  }
  0xba   :  { %925 = vst.msk [vmem:[#allocation0 + $0x10] sm:$0xf] %vm887_vm10, %v922_v36   ;;  %927 = vst.msk [vmem:[#allocation0 + $0x14] sm:$0xf0] %vm887_vm10, %v922_v36   ;;  %v1141_v42 = vpop.permute.xlu1 %1140  }
  0xbb   :  { %888 = vst.msk [vmem:[#allocation0] sm:$0xf] %vm887_vm10, %v886_v37   ;;  %890 = vst.msk [vmem:[#allocation0 + $0x4] sm:$0xf0] %vm887_vm10, %v886_v37  }
  0xbc   :  { %998 = vst.msk [vmem:[#allocation0 + $0x10] sm:$0xf] %vm960_vm11, %v995_v38   ;;  %1000 = vst.msk [vmem:[#allocation0 + $0x14] sm:$0xf0] %vm960_vm11, %v995_v38  }
  0xbd   :  { %961 = vst.msk [vmem:[#allocation0] sm:$0xf] %vm960_vm11, %v959_v39   ;;  %963 = vst.msk [vmem:[#allocation0 + $0x4] sm:$0xf0] %vm960_vm11, %v959_v39  }
  0xbe   :  { %1071 = vst.msk [vmem:[#allocation0 + $0x10] sm:$0xf] %vm1033_vm12, %v1068_v40   ;;  %1073 = vst.msk [vmem:[#allocation0 + $0x14] sm:$0xf0] %vm1033_vm12, %v1068_v40  }
  0xbf   :  { %v1032_v41 = vpop.permute.xlu0 %1031   ;;  %1144 = vst.msk [vmem:[#allocation0 + $0x10] sm:$0xf] %vm1106_vm13, %v1141_v42   ;;  %1146 = vst.msk [vmem:[#allocation0 + $0x14] sm:$0xf0] %vm1106_vm13, %v1141_v42  }
  0xc0   :  { %1034 = vst.msk [vmem:[#allocation0] sm:$0xf] %vm1033_vm12, %v1032_v41   ;;  %1036 = vst.msk [vmem:[#allocation0 + $0x4] sm:$0xf0] %vm1033_vm12, %v1032_v41  }
  0xc3   :  { %v1105_v43 = vpop.permute.xlu0 %1104  }
  0xc4   :  { %1107 = vst.msk [vmem:[#allocation0] sm:$0xf] %vm1106_vm13, %v1105_v43   ;;  %1109 = vst.msk [vmem:[#allocation0 + $0x4] sm:$0xf0] %vm1106_vm13, %v1105_v43  }
  0xcc   :  { %v1214_v44 = vpop.permute.xlu1 %1213  }
  0xcd   :  { %1217 = vst.msk [vmem:[#allocation0 + $0x10] sm:$0xf] %vm1179_vm14, %v1214_v44   ;;  %1219 = vst.msk [vmem:[#allocation0 + $0x14] sm:$0xf0] %vm1179_vm14, %v1214_v44  }
  0xd1   :  { %v1178_v46 = vpop.permute.xlu0 %1177  }
  0xd2   :  { %1180 = vst.msk [vmem:[#allocation0] sm:$0xf] %vm1179_vm14, %v1178_v46   ;;  %1182 = vst.msk [vmem:[#allocation0 + $0x4] sm:$0xf0] %vm1179_vm14, %v1178_v46  }
  0xd3   :  { %v1287_v45 = vpop.permute.xlu1 %1286  }
  0xd4   :  { %1290 = vst.msk [vmem:[#allocation0 + $0x10] sm:$0xf] %vm1252_vm15, %v1287_v45   ;;  %1292 = vst.msk [vmem:[#allocation0 + $0x14] sm:$0xf0] %vm1252_vm15, %v1287_v45  }
  0xd5   :  { %v1251_v47 = vpop.permute.xlu0 %1250  }
  0xd6   :  { %1253 = vst.msk [vmem:[#allocation0] sm:$0xf] %vm1252_vm15, %v1251_v47   ;;  %1255 = vst.msk [vmem:[#allocation0 + $0x4] sm:$0xf0] %vm1252_vm15, %v1251_v47  }
  0xe1   :  { %v1360_v48 = vpop.permute.xlu1 %1359  }
  0xe2   :  { %1363 = vst.msk [vmem:[#allocation0 + $0x10] sm:$0xf] %vm1325_vm0, %v1360_v48   ;;  %1365 = vst.msk [vmem:[#allocation0 + $0x14] sm:$0xf0] %vm1325_vm0, %v1360_v48  }
  0xe8   :  { %v1433_v50 = vpop.permute.xlu1 %1432  }
  0xe9   :  { %v1324_v49 = vpop.permute.xlu0 %1323   ;;  %1436 = vst.msk [vmem:[#allocation0 + $0x10] sm:$0xf] %vm1398_vm1, %v1433_v50   ;;  %1438 = vst.msk [vmem:[#allocation0 + $0x14] sm:$0xf0] %vm1398_vm1, %v1433_v50  }
  0xea   :  { %1326 = vst.msk [vmem:[#allocation0] sm:$0xf] %vm1325_vm0, %v1324_v49   ;;  %1328 = vst.msk [vmem:[#allocation0 + $0x4] sm:$0xf0] %vm1325_vm0, %v1324_v49  }
  0xed   :  { %v1397_v51 = vpop.permute.xlu0 %1396  }
  0xee   :  { %1399 = vst.msk [vmem:[#allocation0] sm:$0xf] %vm1398_vm1, %v1397_v51   ;;  %1401 = vst.msk [vmem:[#allocation0 + $0x4] sm:$0xf0] %vm1398_vm1, %v1397_v51  }
  0xf5   :  { %v1506_v52 = vpop.permute.xlu1 %1505  }
  0xf6   :  { %1509 = vst.msk [vmem:[#allocation0 + $0x10] sm:$0xf] %vm1471_vm2, %v1506_v52   ;;  %1511 = vst.msk [vmem:[#allocation0 + $0x14] sm:$0xf0] %vm1471_vm2, %v1506_v52  }
  0xfd   :  { %v1470_v53 = vpop.permute.xlu0 %1469  }
  0xfe   :  { %v1579_v54 = vpop.permute.xlu1 %1578   ;;  %1472 = vst.msk [vmem:[#allocation0] sm:$0xf] %vm1471_vm2, %v1470_v53   ;;  %1474 = vst.msk [vmem:[#allocation0 + $0x4] sm:$0xf0] %vm1471_vm2, %v1470_v53  }
  0xff   :  { %1582 = vst.msk [vmem:[#allocation0 + $0x10] sm:$0xf] %vm1544_vm3, %v1579_v54   ;;  %1584 = vst.msk [vmem:[#allocation0 + $0x14] sm:$0xf0] %vm1544_vm3, %v1579_v54  }
 0x101   :  { %v1543_v55 = vpop.permute.xlu0 %1542  }
 0x102   :  { %1545 = vst.msk [vmem:[#allocation0] sm:$0xf] %vm1544_vm3, %v1543_v55   ;;  %1547 = vst.msk [vmem:[#allocation0 + $0x4] sm:$0xf0] %vm1544_vm3, %v1543_v55  }
 0x10b   :  { %v1652_v56 = vpop.permute.xlu1 %1651  }
 0x10c   :  { %1655 = vst.msk [vmem:[#allocation0 + $0x10] sm:$0xf] %vm1617_vm4, %v1652_v56   ;;  %1657 = vst.msk [vmem:[#allocation0 + $0x14] sm:$0xf0] %vm1617_vm4, %v1652_v56  }
 0x113   :  { %v1616_v57 = vpop.permute.xlu0 %1615  }
 0x114   :  { %v1725_v58 = vpop.permute.xlu1 %1724   ;;  %1618 = vst.msk [vmem:[#allocation0] sm:$0xf] %vm1617_vm4, %v1616_v57   ;;  %1620 = vst.msk [vmem:[#allocation0 + $0x4] sm:$0xf0] %vm1617_vm4, %v1616_v57  }
 0x115   :  { %1728 = vst.msk [vmem:[#allocation0 + $0x10] sm:$0xf] %vm1690_vm5, %v1725_v58   ;;  %1730 = vst.msk [vmem:[#allocation0 + $0x14] sm:$0xf0] %vm1690_vm5, %v1725_v58  }
 0x117   :  { %v1689_v59 = vpop.permute.xlu0 %1688  }
 0x118   :  { %1691 = vst.msk [vmem:[#allocation0] sm:$0xf] %vm1690_vm5, %v1689_v59   ;;  %1693 = vst.msk [vmem:[#allocation0 + $0x4] sm:$0xf0] %vm1690_vm5, %v1689_v59  }
 0x122   :  { %v1798_v60 = vpop.permute.xlu1 %1797  }
 0x123   :  { %1801 = vst.msk [vmem:[#allocation0 + $0x10] sm:$0xf] %vm1763_vm6, %v1798_v60   ;;  %1803 = vst.msk [vmem:[#allocation0 + $0x14] sm:$0xf0] %vm1763_vm6, %v1798_v60  }
 0x128   :  { %v1762_v61 = vpop.permute.xlu0 %1761  }
 0x129   :  { %1764 = vst.msk [vmem:[#allocation0] sm:$0xf] %vm1763_vm6, %v1762_v61   ;;  %1766 = vst.msk [vmem:[#allocation0 + $0x4] sm:$0xf0] %vm1763_vm6, %v1762_v61  }
 0x12a   :  { %v1819_v62 = vld [vmem:[#allocation0 + $0x10] sm:$0xf]  ;;  %v1826_v63 = vld [vmem:[#allocation0 + $0x18] sm:$0xf] }
 0x12b   :  { %2088 = vst [vmem:[%s2769_s1 + $0x8] sm:$0xf] %v1819_v62  ;;  %2089 = vst [vmem:[%s2769_s1 + $0xc] sm:$0xf] %v1826_v63 }
 0x130   :  { %v1808_v0 = vld [vmem:[#allocation0] sm:$0xf]  ;;  %v1813_v1 = vld [vmem:[#allocation0 + $0x8] sm:$0xf] }
 0x131   :  { %1811 = vst [vmem:[%s2769_s1] sm:$0xf] %v1808_v0  ;;  %2087 = vst [vmem:[%s2769_s1 + $0x4] sm:$0xf] %v1813_v1 }

// kernel: reverse.2
= control target key start
LH: loop header
LB: loop body
LE: loop exit
PB: predicated region body
PF: predicated region fallthrough
CT: control target
= control target key end

     0   :  { %v72_v3 = vlaneseq  ;;  %v65_v9 = vld [vmem:[#allocation0 + $0x7] ss:$-1 sm:$0xff]  ;;  %v79_v12 = vld [vmem:[#allocation0 + $0x17] ss:$-1 sm:$0xff]  ;;  %s331_s0 = inlined_call_operand.vmem [shape: f32[4,2,16,7], index: 0, kind: input, shape index: {}]   ;;  %s332_s1 = inlined_call_operand.vmem [shape: f32[4,2,16,7], index: 1, kind: output, shape index: {}]  }
   0x1   :  { %v45_v0 = vld [vmem:[%s331_s0] sm:$0xff]  ;;  %v47_v1 = vld [vmem:[%s331_s0 + $0x8] sm:$0xff]  ;;  %v49_v2 = vld [vmem:[%s331_s0 + $0x10] sm:$0xff]  ;;  %v66_v10 = vrot.slane %v65_v9, 1  ;;  %v80_v14 = vrot.slane %v79_v12, 1 }
   0x2   :  { %46 = vst [vmem:[#allocation0 + $0x8] sm:$0xff] %v45_v0  ;;  %48 = vst [vmem:[#allocation0 + $0x18] sm:$0xff] %v47_v1  ;;  %v51_v4 = vld [vmem:[%s331_s0 + $0x18] sm:$0xff]  ;;  %v53_v5 = vld [vmem:[%s331_s0 + $0x20] sm:$0xff]  ;;  %v73_v11 = vshrl.u32 %v72_v3, 7 }
   0x3   :  { %50 = vst [vmem:[#allocation0 + $0x28] sm:$0xff] %v49_v2  ;;  %v55_v6 = vld [vmem:[%s331_s0 + $0x28] sm:$0xff]  ;;  %52 = vst [vmem:[#allocation0 + $0x38] sm:$0xff] %v51_v4  ;;  %v57_v7 = vld [vmem:[%s331_s0 + $0x30] sm:$0xff] }
   0x4   :  { %54 = vst [vmem:[#allocation0 + $0x48] sm:$0xff] %v53_v5  ;;  %56 = vst [vmem:[#allocation0 + $0x58] sm:$0xff] %v55_v6  ;;  %v59_v8 = vld [vmem:[%s331_s0 + $0x38] sm:$0xff]  ;;  %v93_v13 = vld [vmem:[#allocation0 + $0x27] ss:$-1 sm:$0xff]  ;;  %vm74_vm0 = vcmp.lt.s32.totalorder %v73_v11, 7 }
   0x5   :  { %58 = vst [vmem:[#allocation0 + $0x68] sm:$0xff] %v57_v7  ;;  %60 = vst [vmem:[#allocation0 + $0x78] sm:$0xff] %v59_v8  ;;  %v94_v15 = vrot.slane %v93_v13, 1  ;;  %v107_v16 = vld [vmem:[#allocation0 + $0x37] ss:$-1 sm:$0xff] }
   0x6   :  { %67 = vst [vmem:[#allocation1] sm:$0xff] %v66_v10  ;;  %v108_v17 = vrot.slane %v107_v16, 1  ;;  %v121_v18 = vld [vmem:[#allocation0 + $0x47] ss:$-1 sm:$0xff]  ;;  %v135_v19 = vld [vmem:[#allocation0 + $0x57] ss:$-1 sm:$0xff] }
   0x7   :  { %81 = vst [vmem:[#allocation1 + $0x8] sm:$0xff] %v80_v14  ;;  %95 = vst [vmem:[#allocation1 + $0x10] sm:$0xff] %v94_v15  ;;  %v122_v20 = vrot.slane %v121_v18, 1  ;;  %v136_v21 = vrot.slane %v135_v19, 1  ;;  %v149_v22 = vld [vmem:[#allocation0 + $0x67] ss:$-1 sm:$0xff] }
   0x8   :  { %v163_v23 = vld [vmem:[#allocation0 + $0x77] ss:$-1 sm:$0xff]  ;;  %109 = vst [vmem:[#allocation1 + $0x18] sm:$0xff] %v108_v17  ;;  %v150_v24 = vrot.slane %v149_v22, 1 }
   0x9   :  { %v164_v25 = vrot.slane %v163_v23, 1  ;;  %v70_v26 = vld [vmem:[#allocation0 + $0xf] ss:$-1 sm:$0xff]  ;;  %v84_v27 = vld [vmem:[#allocation0 + $0x1f] ss:$-1 sm:$0xff]  ;;  %123 = vst [vmem:[#allocation1 + $0x20] sm:$0xff] %v122_v20 }
   0xa   :  { %v98_v28 = vld [vmem:[#allocation0 + $0x2f] ss:$-1 sm:$0xff]  ;;  %137 = vst [vmem:[#allocation1 + $0x28] sm:$0xff] %v136_v21  ;;  %v71_v29 = vrot.slane %v70_v26, 1  ;;  %v85_v30 = vrot.slane %v84_v27, 1  ;;  %151 = vst [vmem:[#allocation1 + $0x30] sm:$0xff] %v150_v24 }
   0xb   :  { %v99_v31 = vrot.slane %v98_v28, 1  ;;  %v112_v32 = vld [vmem:[#allocation0 + $0x3f] ss:$-1 sm:$0xff]  ;;  %165 = vst [vmem:[#allocation1 + $0x38] sm:$0xff] %v164_v25  ;;  %v126_v34 = vld [vmem:[#allocation0 + $0x4f] ss:$-1 sm:$0xff] }
   0xc   :  { %v113_v33 = vrot.slane %v112_v32, 1  ;;  %v140_v35 = vld [vmem:[#allocation0 + $0x5f] ss:$-1 sm:$0xff]  ;;  %75 = vst.msk [vmem:[#allocation1] sm:$0xff] %vm74_vm0, %v71_v29  ;;  %89 = vst.msk [vmem:[#allocation1 + $0x8] sm:$0xff] %vm74_vm0, %v85_v30  ;;  %v127_v36 = vrot.slane %v126_v34, 1 }
   0xd   :  { %103 = vst.msk [vmem:[#allocation1 + $0x10] sm:$0xff] %vm74_vm0, %v99_v31  ;;  %v141_v37 = vrot.slane %v140_v35, 1  ;;  %v154_v38 = vld [vmem:[#allocation0 + $0x6f] ss:$-1 sm:$0xff]  ;;  %v168_v39 = vld [vmem:[#allocation0 + $0x7f] ss:$-1 sm:$0xff] }
   0xe   :  { %117 = vst.msk [vmem:[#allocation1 + $0x18] sm:$0xff] %vm74_vm0, %v113_v33  ;;  %v155_v40 = vrot.slane %v154_v38, 1  ;;  %v169_v41 = vrot.slane %v168_v39, 1  ;;  %131 = vst.msk [vmem:[#allocation1 + $0x20] sm:$0xff] %vm74_vm0, %v127_v36 }
   0xf   :  { %145 = vst.msk [vmem:[#allocation1 + $0x28] sm:$0xff] %vm74_vm0, %v141_v37 }
  0x10   :  { %159 = vst.msk [vmem:[#allocation1 + $0x30] sm:$0xff] %vm74_vm0, %v155_v40  ;;  %173 = vst.msk [vmem:[#allocation1 + $0x38] sm:$0xff] %vm74_vm0, %v169_v41 }
  0x13   :  { %v216_v42 = vld [vmem:[#allocation1] sm:$0xff]  ;;  %v218_v43 = vld [vmem:[#allocation1 + $0x8] sm:$0xff] }
  0x14   :  { %v220_v44 = vld [vmem:[#allocation1 + $0x10] sm:$0xff]  ;;  %217 = vst [vmem:[%s332_s1] sm:$0xff] %v216_v42  ;;  %219 = vst [vmem:[%s332_s1 + $0x8] sm:$0xff] %v218_v43 }
  0x15   :  { %221 = vst [vmem:[%s332_s1 + $0x10] sm:$0xff] %v220_v44  ;;  %v222_v45 = vld [vmem:[#allocation1 + $0x18] sm:$0xff]  ;;  %v224_v46 = vld [vmem:[#allocation1 + $0x20] sm:$0xff] }
  0x16   :  { %223 = vst [vmem:[%s332_s1 + $0x18] sm:$0xff] %v222_v45  ;;  %v226_v47 = vld [vmem:[#allocation1 + $0x28] sm:$0xff]  ;;  %225 = vst [vmem:[%s332_s1 + $0x20] sm:$0xff] %v224_v46 }
  0x17   :  { %227 = vst [vmem:[%s332_s1 + $0x28] sm:$0xff] %v226_v47  ;;  %v228_v48 = vld [vmem:[#allocation1 + $0x30] sm:$0xff]  ;;  %v230_v49 = vld [vmem:[#allocation1 + $0x38] sm:$0xff] }
  0x18   :  { %229 = vst [vmem:[%s332_s1 + $0x30] sm:$0xff] %v228_v48  ;;  %231 = vst [vmem:[%s332_s1 + $0x38] sm:$0xff] %v230_v49 }

// kernel: ffc_forward.7
= control target key start
LH: loop header
LB: loop body
LE: loop exit
PB: predicated region body
PF: predicated region fallthrough
CT: control target
= control target key end

     0   :  { %vm79_vm0 = vcmask 1043456   ;;  %v492_v3 = vmov 0   ;;  %vm75_vm1 = vcmask 64512   ;;  %vm283_vm2 = vcmask 1041408   ;;  %s650_s1 = inlined_call_operand.vmem [shape: f32[8,512], index: 1, kind: input, shape index: {}]   ;;  %s651_s6 = inlined_call_operand.vmem [shape: f32[8,8], index: 6, kind: input, shape index: {}]   ;;  %s652_s0 = inlined_call_operand.vmem [shape: f32[8,512], index: 0, kind: input, shape index: {}]   ;;  %s653_s2 = inlined_call_operand.vmem [shape: f32[4,512], index: 2, kind: input, shape index: {}]   ;;  %s654_s3 = inlined_call_operand.vmem [shape: f32[4,512], index: 3, kind: input, shape index: {}]   ;;  %s655_s4 = inlined_call_operand.vmem [shape: f32[4,512], index: 4, kind: input, shape index: {}]   ;;  %s656_s5 = inlined_call_operand.vmem [shape: f32[8,8], index: 5, kind: input, shape index: {}]   ;;  %s657_s8 = inlined_call_operand.vmem [shape: f32[8,4], index: 8, kind: input, shape index: {}]   ;;  %s658_s7 = inlined_call_operand.vmem [shape: f32[8,8], index: 7, kind: input, shape index: {}]   ;;  %s659_s9 = inlined_call_operand.vmem [shape: f32[8,512], index: 9, kind: output, shape index: {0}]   ;;  %s660_s10 = inlined_call_operand.vmem [shape: f32[8,512], index: 10, kind: output, shape index: {1}]  }
   0x1   :  { %v44_v0 = vld [vmem:[%s650_s1 + $0x8] sm:$0xff]  ;;  %v46_v1 = vld [vmem:[%s650_s1 + $0x18] sm:$0xff]  ;;  %v43_v2 = vld [vmem:[%s650_s1] sm:$0xff]  ;;  %124 = vmatprep.mubr.bf16.mxu0 %v492_v3  ;;  %165 = vmatprep.mubr.bf16.mxu1 %v492_v3  ;;  %vm279_vm3 = vcmask 31744  }
   0x2   :  { %v48_v4 = vpack.c.bf16 %v44_v0, %v44_v0  ;;  %v50_v5 = vpack.c.bf16 %v46_v1, %v46_v1  ;;  %v47_v6 = vpack.c.bf16 %v43_v2, %v43_v2  ;;  %v45_v7 = vld [vmem:[%s650_s1 + $0x10] sm:$0xff]  ;;  %v73_v8 = vld [vmem:[%s651_s6] sm:$0xff]  ;;  %v36_v9 = vld [vmem:[%s652_s0 + $0x8] sm:$0xff] }
   0x3   :  { %v49_v10 = vpack.c.bf16 %v45_v7, %v45_v7  ;;  %v74_v11 = vpack.c.bf16 %v73_v8, %v73_v8  ;;  %v40_v12 = vpack.c.bf16 %v36_v9, %v36_v9  ;;  %v38_v13 = vld [vmem:[%s652_s0 + $0x18] sm:$0xff]  ;;  %v35_v14 = vld [vmem:[%s652_s0] sm:$0xff]  ;;  %v37_v15 = vld [vmem:[%s652_s0 + $0x10] sm:$0xff] }
   0x4   :  { %475 = vmatprep.subr.msk.bf16.mxu0 %vm79_vm0, %v48_v4  ;;  %477 = vmatprep.subr.msk.bf16.mxu1 %vm79_vm0, %v50_v5  ;;  %v81_v16 = vsel %vm79_vm0, %v47_v6, 0  ;;  %v42_v17 = vpack.c.bf16 %v38_v13, %v38_v13  ;;  %v39_v18 = vpack.c.bf16 %v35_v14, %v35_v14  ;;  %v41_v19 = vpack.c.bf16 %v37_v15, %v37_v15  ;;  %v51_v20 = vld [vmem:[%s653_s2] sm:$0xff]  ;;  %v52_v25 = vld [vmem:[%s653_s2 + $0x8] sm:$0xff] }
   0x5   :  { %v53_v21 = vld [vmem:[%s654_s3] sm:$0xff]  ;;  %107 = vmatpush1.bf16.msra.mxu0 %v81_v16  ;;  %v87_v22 = vsel %vm79_vm0, %v49_v10, 0  ;;  %v54_v26 = vld [vmem:[%s654_s3 + $0x8] sm:$0xff] }
   0x6   :  { %v55_v23 = vadd.f32 %v53_v21, %v51_v20  ;;  %v57_v24 = vld [vmem:[%s655_s4] sm:$0xff]  ;;  %148 = vmatpush1.bf16.msra.mxu1 %v87_v22  ;;  %479 = vmatprep.subr.msk.bf16.mxu0 %vm79_vm0, %v40_v12  ;;  %v178_v27 = vsel %vm79_vm0, %v39_v18, 0  ;;  %v56_v28 = vadd.f32 %v54_v26, %v52_v25  ;;  %v58_v29 = vld [vmem:[%s655_s4 + $0x8] sm:$0xff]  ;;  %v184_v30 = vsel %vm79_vm0, %v41_v19, 0 }
   0x7   :  { %481 = vmatprep.subr.msk.bf16.mxu1 %vm79_vm0, %v42_v17  ;;  %v71_v33 = vld [vmem:[%s656_s5] sm:$0xff] }
   0x8   :  { %v59_v31 = vadd.f32 %v57_v24, %v55_v23  ;;  %476 = vmatmul.mubr.msk.bf16.vlgmr.msra.gmra.mxu0 %vm75_vm1, %v74_v11  ;;  %v60_v32 = vadd.f32 %v58_v29, %v56_v28  ;;  %v72_v39 = vpack.c.bf16 %v71_v33, %v71_v33  ;;  %v277_v43 = vld [vmem:[%s657_s8] sm:$0xff] }
   0x9   :  { %478 = vmatmul.mubr.msk.bf16.vlgmr.msra.gmra.mxu1 %vm75_vm1, %v74_v11  ;;  %204 = vmatpush1.bf16.msra.mxu0 %v178_v27  ;;  %v278_v44 = vpack.c.bf16 %v277_v43, %v277_v43  ;;  %v275_v45 = vld [vmem:[%s658_s7] sm:$0xff] }
   0xa   :  { %v63_v34 = vcombine.high %v59_v31, %v59_v31  ;;  %245 = vmatpush1.bf16.msra.mxu1 %v184_v30  ;;  %221 = vmatprep.mubr.bf16.mxu0 %v492_v3  ;;  %v64_v35 = vcombine.high %v60_v32, %v60_v32  ;;  %v67_v36 = vpack.c.bf16 %v59_v31, %v59_v31 }
   0xb   :  { %262 = vmatprep.mubr.bf16.mxu1 %v492_v3  ;;  %v69_v38 = vpack.c.bf16 %v60_v32, %v60_v32  ;;  %v276_v46 = vpack.c.bf16 %v275_v45, %v275_v45 }
   0xc   :  { %v68_v37 = vpack.c.bf16 %v63_v34, %v63_v34  ;;  %v70_v40 = vpack.c.bf16 %v64_v35, %v64_v35  ;;  %v285_v41 = vsel %vm283_vm2, %v67_v36, 0 }
   0xd   :  { %v291_v42 = vsel %vm283_vm2, %v69_v38, 0 }
   0xe   :  { %483 = vmatprep.subr.msk.bf16.mxu0 %vm283_vm2, %v68_v37  ;;  %485 = vmatprep.subr.msk.bf16.mxu1 %vm283_vm2, %v70_v40 }
  0x10   :  { %480 = vmatmul.mubr.msk.bf16.vlgmr.msra.gmra.mxu0 %vm75_vm1, %v72_v39 }
  0x11   :  { %482 = vmatmul.mubr.msk.bf16.vlgmr.msra.gmra.mxu1 %vm75_vm1, %v72_v39  ;;  %311 = vmatpush1.bf16.msra.mxu0 %v285_v41 }
  0x12   :  { %352 = vmatpush1.bf16.msra.mxu1 %v291_v42  ;;  %328 = vmatprep.mubr.bf16.mxu0 %v492_v3 }
  0x13   :  { %369 = vmatprep.mubr.bf16.mxu1 %v492_v3  ;;  %487 = vmatprep.subr.msk.bf16.mxu0 %vm79_vm0, %v40_v12 }
  0x14   :  { %489 = vmatprep.subr.msk.bf16.mxu1 %vm79_vm0, %v42_v17 }
  0x18   :  { %484 = vmatmul.mubr.msk.bf16.vlgmr.msra.gmra.mxu0 %vm279_vm3, %v278_v44 }
  0x19   :  { %486 = vmatmul.mubr.msk.bf16.vlgmr.msra.gmra.mxu1 %vm279_vm3, %v278_v44  ;;  %396 = vmatpush1.bf16.msra.mxu0 %v178_v27 }
  0x1a   :  { %437 = vmatpush1.bf16.msra.mxu1 %v184_v30  ;;  %413 = vmatprep.mubr.bf16.mxu0 %v492_v3 }
  0x1b   :  { %454 = vmatprep.mubr.bf16.mxu1 %v492_v3 }
  0x20   :  { %488 = vmatmul.mubr.msk.bf16.vlgmr.msra.gmra.mxu0 %vm75_vm1, %v276_v46 }
  0x21   :  { %490 = vmatmul.mubr.msk.bf16.vlgmr.msra.gmra.mxu1 %vm75_vm1, %v276_v46 }
  0xc8   :  { %v126_v47 = vpop.f32.mrf.mxu0 }
  0xc9   :  { %v167_v48 = vpop.f32.mrf.mxu1 }
  0xca   :  { %v128_v49 = vpop.f32.mrf.mxu0 }
  0xcb   :  { %v169_v50 = vpop.f32.mrf.mxu1 }
  0xcc   :  { %v130_v51 = vpop.f32.mrf.mxu0 }
  0xcd   :  { %v171_v52 = vpop.f32.mrf.mxu1 }
  0xce   :  { %v131_v53 = vpop.f32.mrf.mxu0 }
  0xcf   :  { %v172_v54 = vpop.f32.mrf.mxu1 }
  0xd0   :  { %v223_v55 = vpop.f32.mrf.mxu0 }
  0xd1   :  { %v224_v56 = vadd.f32 %v223_v55, %v126_v47  ;;  %v264_v57 = vpop.f32.mrf.mxu1 }
  0xd2   :  { %v265_v58 = vadd.f32 %v264_v57, %v167_v48  ;;  %v225_v59 = vpop.f32.mrf.mxu0 }
  0xd3   :  { %271 = vst [vmem:[%s659_s9] sm:$0xff] %v224_v56  ;;  %v226_v60 = vadd.f32 %v225_v59, %v128_v49  ;;  %v266_v61 = vpop.f32.mrf.mxu1 }
  0xd4   :  { %273 = vst [vmem:[%s659_s9 + $0x10] sm:$0xff] %v265_v58  ;;  %v267_v62 = vadd.f32 %v266_v61, %v169_v50  ;;  %v227_v63 = vpop.f32.mrf.mxu0 }
  0xd5   :  { %272 = vst [vmem:[%s659_s9 + $0x8] sm:$0xff] %v226_v60  ;;  %v268_v0 = vpop.f32.mrf.mxu1 }
  0xd6   :  { %274 = vst [vmem:[%s659_s9 + $0x18] sm:$0xff] %v267_v62  ;;  %v228_v1 = vpop.f32.mrf.mxu0 }
  0xd7   :  { %v269_v2 = vpop.f32.mrf.mxu1 }
  0xd8   :  { %v330_v3 = vpop.f32.mrf.mxu0 }
  0xd9   :  { %v371_v4 = vpop.f32.mrf.mxu1 }
  0xda   :  { %v332_v5 = vpop.f32.mrf.mxu0 }
  0xdb   :  { %v373_v6 = vpop.f32.mrf.mxu1 }
  0xdc   :  { %v334_v7 = vpop.f32.mrf.mxu0 }
  0xdd   :  { %v375_v8 = vpop.f32.mrf.mxu1 }
  0xde   :  { %v335_v9 = vpop.f32.mrf.mxu0 }
  0xdf   :  { %v376_v10 = vpop.f32.mrf.mxu1 }
  0xe0   :  { %v415_v11 = vpop.f32.mrf.mxu0 }
  0xe1   :  { %v416_v12 = vadd.f32 %v415_v11, %v330_v3  ;;  %v456_v13 = vpop.f32.mrf.mxu1 }
  0xe2   :  { %v457_v14 = vadd.f32 %v456_v13, %v371_v4  ;;  %v417_v15 = vpop.f32.mrf.mxu0 }
  0xe3   :  { %463 = vst [vmem:[%s660_s10] sm:$0xff] %v416_v12  ;;  %v418_v16 = vadd.f32 %v417_v15, %v332_v5  ;;  %v458_v17 = vpop.f32.mrf.mxu1 }
  0xe4   :  { %465 = vst [vmem:[%s660_s10 + $0x10] sm:$0xff] %v457_v14  ;;  %v459_v18 = vadd.f32 %v458_v17, %v373_v6  ;;  %v419_v19 = vpop.f32.mrf.mxu0 }
  0xe5   :  { %464 = vst [vmem:[%s660_s10 + $0x8] sm:$0xff] %v418_v16  ;;  %v460_v20 = vpop.f32.mrf.mxu1 }
  0xe6   :  { %466 = vst [vmem:[%s660_s10 + $0x18] sm:$0xff] %v459_v18  ;;  %v420_v21 = vpop.f32.mrf.mxu0 }
  0xe7   :  { %v461_v22 = vpop.f32.mrf.mxu1 }

</bundles_post_ra>
